<compile_context>
chip_gen: v6e
topology: v6e:2x2x1
jax: 0.10.0
libtpu: 0.0.40
codegen_flags: <defaults>
</compile_context>

<pallas_src>
import math

import jax
import jax.numpy as jnp
from jax import lax
from jax.experimental import pallas as pl
from jax.experimental.pallas import tpu as pltpu


# ----------------------------- Pallas kernels ------------------------------


def _conv_pool_kernel(p_ref, w_ref, b_ref, o_ref):
    """Fused conv (one tall im2col matmul) + 2x2 maxpool + bias + ReLU.

    p_ref: (1, 4*R, K) bf16 im2col rows ordered (pool-tap, image, position).
    w_ref: (K, Cout) bf16.  b_ref: (1, Cout) f32.  o_ref: (R, Cout) bf16.
    """
    h = jnp.dot(p_ref[0], w_ref[...], preferred_element_type=jnp.float32)
    r = o_ref.shape[0]
    # 2x2 max-pool over the 4 tap row-blocks, then bias + ReLU once.
    m = jnp.maximum(jnp.maximum(h[0:r], h[r:2 * r]),
                    jnp.maximum(h[2 * r:3 * r], h[3 * r:4 * r]))
    o_ref[...] = jnp.maximum(m + b_ref[...], 0.0).astype(o_ref.dtype)


def _conv2_mlp_kernel(p_ref, w2_ref, b2_ref, wf1_ref, bf1_ref, wf2_ref, bf2_ref,
                      wf3_ref, bf3_ref, o_ref):
    """conv2 + bias + ReLU + 2x2 maxpool + flatten + fc1/fc2/fc3 (+ReLUs).

    p_ref: (1, 4*25*B, 400) bf16, rows ordered (tap, pooled-position s, image b).
    o_ref: (B, 10) f32 logits.
    """
    B = o_ref.shape[0]
    h = jnp.dot(p_ref[0], w2_ref[...], preferred_element_type=jnp.float32)
    r = 25 * B
    m = jnp.maximum(jnp.maximum(h[0:r], h[r:2 * r]),
                    jnp.maximum(h[2 * r:3 * r], h[3 * r:4 * r]))
    y = jnp.maximum(m + b2_ref[...], 0.0)            # (25*B, 32), rows (s, b)

    # Flatten: features ordered (s, c); fc1 weights are permuted to match.
    flat = jnp.concatenate([y[s * B:(s + 1) * B] for s in range(25)], axis=1)
    flat = flat.astype(wf1_ref.dtype)                # (B, 800) bf16

    h1 = jnp.maximum(
        jnp.dot(flat, wf1_ref[...], preferred_element_type=jnp.float32)
        + bf1_ref[...], 0.0).astype(wf2_ref.dtype)
    h2 = jnp.maximum(
        jnp.dot(h1, wf2_ref[...], preferred_element_type=jnp.float32)
        + bf2_ref[...], 0.0).astype(wf3_ref.dtype)
    out = (jnp.dot(h2, wf3_ref[...], preferred_element_type=jnp.float32)
           + bf3_ref[...])
    o_ref[...] = out.astype(o_ref.dtype)


# --------------------------- pallas_call wrappers ---------------------------


def conv_relu_pool(patches_c, w_mat, b_row):
    """patches_c: (G, 4*R, K) bf16 chunked tap-ordered im2col patches.
    Returns (G*R, Cout) bf16 pooled activations, rows = (image, position)."""
    G, rows4, K = patches_c.shape
    R = rows4 // 4
    Cout = w_mat.shape[1]
    return pl.pallas_call(
        _conv_pool_kernel,
        out_shape=jax.ShapeDtypeStruct((G * R, Cout), jnp.bfloat16),
        grid=(G,),
        in_specs=[
            pl.BlockSpec((1, rows4, K), lambda i: (i, 0, 0)),
            pl.BlockSpec((K, Cout), lambda i: (0, 0)),
            pl.BlockSpec((1, Cout), lambda i: (0, 0)),
        ],
        out_specs=pl.BlockSpec((R, Cout), lambda i: (i, 0)),
        compiler_params=pltpu.CompilerParams(
            dimension_semantics=("parallel",)),
    )(patches_c, w_mat, b_row)


def conv2_mlp(patches_c, w2, b2, wf1, bf1, wf2, bf2, wf3, bf3):
    """patches_c: (G, 4*25*B, 400) bf16.  Returns (G*B, 10) f32 logits."""
    G, rows4, K = patches_c.shape
    B = rows4 // (4 * 25)
    n_out = wf3.shape[1]

    def full(a):
        return pl.BlockSpec(a.shape, lambda i: (0, 0))

    return pl.pallas_call(
        _conv2_mlp_kernel,
        out_shape=jax.ShapeDtypeStruct((G * B, n_out), jnp.float32),
        grid=(G,),
        in_specs=[
            pl.BlockSpec((1, rows4, K), lambda i: (i, 0, 0)),
            full(w2), full(b2), full(wf1), full(bf1),
            full(wf2), full(bf2), full(wf3), full(bf3),
        ],
        out_specs=pl.BlockSpec((B, n_out), lambda i: (i, 0)),
        compiler_params=pltpu.CompilerParams(
            dimension_semantics=("parallel",)),
    )(patches_c, w2, b2, wf1, bf1, wf2, bf2, wf3, bf3)


# ------------------------------- glue (JAX) --------------------------------


def pool_ordered_patches(x_nhwc, ks=5, pool=2):
    """im2col with rows grouped by max-pool tap.

    Returns (N, 4, PH*PW, ks*ks*C): axis 1 enumerates the (dy, dx) taps of the
    2x2 pooling window; the last axis is flattened in (ky, kx, c) order
    (matching the conv-weight flattening used below)."""
    N, H, W, C = x_nhwc.shape
    OH, OW = H - ks + 1, W - ks + 1
    PH, PW = OH // pool, OW // pool
    a = jnp.arange(PH)
    b = jnp.arange(PW)
    k = jnp.arange(ks)
    blocks = []
    for dy in range(pool):
        for dx in range(pool):
            ii = pool * a[:, None] + dy + k[None, :]       # (PH, ks)
            jj = pool * b[:, None] + dx + k[None, :]       # (PW, ks)
            I = ii[:, :, None, None]                       # (PH, ks, 1, 1)
            J = jj[None, None, :, :]                       # (1, 1, PW, ks)
            patch = x_nhwc[:, I, J, :]                     # (N, PH, ks, PW, ks, C)
            patch = patch.transpose(0, 1, 3, 2, 4, 5)      # (N, PH, PW, ks, ks, C)
            blocks.append(patch.reshape(N, PH * PW, ks * ks * C))
    return jnp.stack(blocks, axis=1)


def _chunk_patches(pp, bb, *, pos_major):
    """(N, 4, P, K) tap-ordered patches -> (N//bb, 4*bb*P, K) batch chunks.

    Rows within a chunk are (tap, image, position) when pos_major=False and
    (tap, position, image) when pos_major=True."""
    N, four, P, K = pp.shape
    pc = pp.reshape(N // bb, bb, four, P, K)
    if pos_major:
        pc = pc.transpose(0, 2, 3, 1, 4)    # (G, 4, P, bb, K)
    else:
        pc = pc.transpose(0, 2, 1, 3, 4)    # (G, 4, bb, P, K)
    return pc.reshape(N // bb, four * bb * P, K)


def init_params(key):
    """Deterministic init (PyTorch-like uniform(-1/sqrt(fan_in), 1/sqrt(fan_in)))."""
    def u(k, shape, fan_in):
        bound = 1.0 / jnp.sqrt(jnp.float32(fan_in))
        return jax.random.uniform(k, shape, jnp.float32, -bound, bound)

    ks = jax.random.split(key, 10)
    p = {}
    p["conv1_w"] = u(ks[0], (16, 3, 5, 5), 3 * 25)    # OIHW (PyTorch layout)
    p["conv1_b"] = u(ks[1], (16,), 3 * 25)
    p["conv2_w"] = u(ks[2], (32, 16, 5, 5), 16 * 25)
    p["conv2_b"] = u(ks[3], (32,), 16 * 25)
    p["fc1_w"] = u(ks[4], (800, 120), 800)            # stored (in, out), torch order
    p["fc1_b"] = u(ks[5], (120,), 800)
    p["fc2_w"] = u(ks[6], (120, 84), 120)
    p["fc2_b"] = u(ks[7], (84,), 120)
    p["fc3_w"] = u(ks[8], (84, 10), 84)
    p["fc3_b"] = u(ks[9], (10,), 84)
    return p


def quantized_cnn_forward(x_nchw, p):
    N = x_nchw.shape[0]
    # Images per grid step: 16/8 keeps blocks 8-row aligned and VMEM per step
    # small (few MB with double buffering, fine for v7x's 64 MiB); small /
    # ragged batches fall back to a single grid step (blocks == full dims).
    if N % 16 == 0:
        bb = 16
    elif N % 8 == 0:
        bb = 8
    else:
        bb = N
    assert N % bb == 0

    x = jnp.transpose(x_nchw, (0, 2, 3, 1)).astype(jnp.bfloat16)      # NHWC bf16

    # ---- conv1 + ReLU + maxpool(2,2): one fused Pallas kernel ----
    w1m = jnp.transpose(p["conv1_w"], (2, 3, 1, 0)).reshape(5 * 5 * 3, 16)
    w1m = w1m.astype(jnp.bfloat16)
    b1 = p["conv1_b"][None, :].astype(jnp.float32)
    p1 = _chunk_patches(pool_ordered_patches(x, 5, 2), bb, pos_major=False)
    y1 = conv_relu_pool(p1, w1m, b1)                  # (N*196, 16) bf16, rows (n, p)
    y1 = y1.reshape(N, 14, 14, 16)

    # ---- conv2 + ReLU + maxpool + flatten + fc1/fc2/fc3: one fused kernel ----
    w2m = jnp.transpose(p["conv2_w"], (2, 3, 1, 0)).reshape(5 * 5 * 16, 32)
    w2m = w2m.astype(jnp.bfloat16)
    b2 = p["conv2_b"][None, :].astype(jnp.float32)
    # fc1 weights permuted from torch's flatten order (c*25 + s) to the kernel's
    # (s*32 + c) flatten order.
    wf1 = p["fc1_w"].reshape(32, 25, 120).transpose(1, 0, 2).reshape(800, 120)
    wf1 = wf1.astype(jnp.bfloat16)
    bf1 = p["fc1_b"][None, :].astype(jnp.float32)
    wf2 = p["fc2_w"].astype(jnp.bfloat16)
    bf2 = p["fc2_b"][None, :].astype(jnp.float32)
    wf3 = p["fc3_w"].astype(jnp.bfloat16)
    bf3 = p["fc3_b"][None, :].astype(jnp.float32)

    p2 = _chunk_patches(pool_ordered_patches(y1, 5, 2), bb, pos_major=True)
    out = conv2_mlp(p2, w2m, b2, wf1, bf1, wf2, bf2, wf3, bf3)        # (N, 10) f32
    # QuantStub/DeQuantStub are identity in the fp32 (non-converted) forward.
    return out


# ------------------------- pure-JAX reference check ------------------------


def ref_forward(x_nchw, p):
    def conv(x, w, b):
        y = lax.conv_general_dilated(x, w, (1, 1), "VALID",
                                     dimension_numbers=("NCHW", "OIHW", "NCHW"))
        return y + b[None, :, None, None]

    def maxpool2(x):
        return lax.reduce_window(x, -jnp.inf, lax.max,
                                 (1, 1, 2, 2), (1, 1, 2, 2), "VALID")

    y = maxpool2(jnp.maximum(conv(x_nchw, p["conv1_w"], p["conv1_b"]), 0.0))
    y = maxpool2(jnp.maximum(conv(y, p["conv2_w"], p["conv2_b"]), 0.0))
    y = y.reshape(y.shape[0], -1)
    y = jnp.maximum(y @ p["fc1_w"] + p["fc1_b"], 0.0)
    y = jnp.maximum(y @ p["fc2_w"] + p["fc2_b"], 0.0)
    return y @ p["fc3_w"] + p["fc3_b"]


if __name__ == "__main__":
    key = jax.random.PRNGKey(0)
    kx, kp = jax.random.split(key)
    # PyTorch NCHW input; 32x32x3 is implied by fc1 = Linear(32*5*5, 120).
    x = jax.random.normal(kx, (2, 3, 32, 32), jnp.float32)
    params = init_params(kp)

    out = jax.jit(quantized_cnn_forward)(x, params)
    out = jax.block_until_ready(out)
    assert out.shape == (2, 10), out.shape

    # fp32 path agreed to ~1e-5 previously; the looser (but tighter-than-before)
    # 1e-2 bound only covers the intentional bf16 cast of activations/weights.
    ref = ref_forward(x, params)
    max_err = float(jnp.max(jnp.abs(out - ref)))
    assert jnp.allclose(out, ref, rtol=1e-2, atol=1e-2), max_err

    print("KERNEL_OK")
</pallas_src>

<mosaic_0001>
module attributes {stable_mosaic.version = 11 : i64} {
  func.func @_conv_pool_kernel(%arg0: i32, %arg1: memref<1x1568x75xbf16, #tpu.memory_space<vmem>>, %arg2: memref<75x16xbf16, #tpu.memory_space<vmem>>, %arg3: memref<1x16xf32, #tpu.memory_space<vmem>>, %arg4: memref<392x16xbf16, #tpu.memory_space<vmem>>) attributes {dimension_semantics = [#tpu.dimension_semantics<parallel>], iteration_bounds = array<i64: 1>, scalar_prefetch = 0 : i64, scratch_operands = 0 : i64, tpu.core_type = #tpu.core_type<tc>, window_params = [{transform_indices = @transform_0, window_bounds = array<i64: 1, 1568, 75>}, {pipeline_mode = #tpu.pipeline_mode<synchronous>, transform_indices = @transform_1, window_bounds = array<i64: 75, 16>}, {pipeline_mode = #tpu.pipeline_mode<synchronous>, transform_indices = @transform_2, window_bounds = array<i64: 1, 16>}, {transform_indices = @transform_3, window_bounds = array<i64: 392, 16>}]} {
    %c0 = arith.constant 0 : index
    %c0_0 = arith.constant 0 : index
    %c0_1 = arith.constant 0 : index
    %0 = vector.load %arg1[%c0, %c0_0, %c0_1] : memref<1x1568x75xbf16, #tpu.memory_space<vmem>>, vector<1x1568x75xbf16>
    %1 = vector.shape_cast %0 : vector<1x1568x75xbf16> to vector<1568x75xbf16>
    %c0_2 = arith.constant 0 : index
    %c0_3 = arith.constant 0 : index
    %2 = vector.load %arg2[%c0_2, %c0_3] : memref<75x16xbf16, #tpu.memory_space<vmem>>, vector<75x16xbf16>
    %cst = arith.constant dense<0.000000e+00> : vector<1568x16xf32>
    %3 = tpu.matmul %1, %2, %cst {dimension_numbers = #tpu.dot_dimension_numbers<[1], [0], [0], [1], [0, 0, 1, 1], [], []>} : vector<1568x75xbf16>, vector<75x16xbf16>, vector<1568x16xf32> -> vector<1568x16xf32>
    %4 = vector.extract_strided_slice %3 {offsets = [0, 0], sizes = [392, 16], strides = [1, 1]} : vector<1568x16xf32> to vector<392x16xf32>
    %5 = vector.extract_strided_slice %3 {offsets = [392, 0], sizes = [392, 16], strides = [1, 1]} : vector<1568x16xf32> to vector<392x16xf32>
    %6 = arith.maximumf %4, %5 : vector<392x16xf32>
    %7 = vector.extract_strided_slice %3 {offsets = [784, 0], sizes = [392, 16], strides = [1, 1]} : vector<1568x16xf32> to vector<392x16xf32>
    %8 = vector.extract_strided_slice %3 {offsets = [1176, 0], sizes = [392, 16], strides = [1, 1]} : vector<1568x16xf32> to vector<392x16xf32>
    %9 = arith.maximumf %7, %8 : vector<392x16xf32>
    %10 = arith.maximumf %6, %9 : vector<392x16xf32>
    %c0_4 = arith.constant 0 : index
    %c0_5 = arith.constant 0 : index
    %11 = vector.load %arg3[%c0_4, %c0_5] : memref<1x16xf32, #tpu.memory_space<vmem>>, vector<1x16xf32>
    %12 = vector.broadcast %11 : vector<1x16xf32> to vector<392x16xf32>
    %13 = arith.addf %10, %12 : vector<392x16xf32>
    %cst_6 = arith.constant 0.000000e+00 : f32
    %14 = vector.broadcast %cst_6 : f32 to vector<392x16xf32>
    %15 = arith.maximumf %13, %14 : vector<392x16xf32>
    %16 = arith.truncf %15 : vector<392x16xf32> to vector<392x16xbf16>
    %c0_7 = arith.constant 0 : index
    %c0_8 = arith.constant 0 : index
    %17 = vector.load %arg4[%c0_7, %c0_8] : memref<392x16xbf16, #tpu.memory_space<vmem>>, vector<392x16xbf16>
    tpu.vector_store %arg4[%c0_7, %c0_8], %16 {strides = array<i32>} : memref<392x16xbf16, #tpu.memory_space<vmem>>, vector<392x16xbf16>,
    return
  }
  func.func @transform_0(%arg0: i32) -> (i32, i32, i32) {
    %c0_i32 = arith.constant 0 : i32
    %c0_i32_0 = arith.constant 0 : i32
    %c0_i32_1 = arith.constant 0 : i32
    return %arg0, %c0_i32, %c0_i32_0 : i32, i32, i32
  }
  func.func @transform_1(%arg0: i32) -> (i32, i32) {
    %c0_i32 = arith.constant 0 : i32
    %c0_i32_0 = arith.constant 0 : i32
    %c0_i32_1 = arith.constant 0 : i32
    return %c0_i32, %c0_i32_0 : i32, i32
  }
  func.func @transform_2(%arg0: i32) -> (i32, i32) {
    %c0_i32 = arith.constant 0 : i32
    %c0_i32_0 = arith.constant 0 : i32
    %c0_i32_1 = arith.constant 0 : i32
    return %c0_i32, %c0_i32_0 : i32, i32
  }
  func.func @transform_3(%arg0: i32) -> (i32, i32) {
    %c0_i32 = arith.constant 0 : i32
    %c0_i32_0 = arith.constant 0 : i32
    return %arg0, %c0_i32 : i32, i32
  }
}

module attributes {stable_mosaic.version = 11 : i64} {
  func.func @_conv2_mlp_kernel(%arg0: i32, %arg1: memref<1x200x400xbf16, #tpu.memory_space<vmem>>, %arg2: memref<400x32xbf16, #tpu.memory_space<vmem>>, %arg3: memref<1x32xf32, #tpu.memory_space<vmem>>, %arg4: memref<800x120xbf16, #tpu.memory_space<vmem>>, %arg5: memref<1x120xf32, #tpu.memory_space<vmem>>, %arg6: memref<120x84xbf16, #tpu.memory_space<vmem>>, %arg7: memref<1x84xf32, #tpu.memory_space<vmem>>, %arg8: memref<84x10xbf16, #tpu.memory_space<vmem>>, %arg9: memref<1x10xf32, #tpu.memory_space<vmem>>, %arg10: memref<2x10xf32, #tpu.memory_space<vmem>>) attributes {dimension_semantics = [#tpu.dimension_semantics<parallel>], iteration_bounds = array<i64: 1>, scalar_prefetch = 0 : i64, scratch_operands = 0 : i64, tpu.core_type = #tpu.core_type<tc>, window_params = [{transform_indices = @transform_0, window_bounds = array<i64: 1, 200, 400>}, {pipeline_mode = #tpu.pipeline_mode<synchronous>, transform_indices = @transform_1, window_bounds = array<i64: 400, 32>}, {pipeline_mode = #tpu.pipeline_mode<synchronous>, transform_indices = @transform_2, window_bounds = array<i64: 1, 32>}, {pipeline_mode = #tpu.pipeline_mode<synchronous>, transform_indices = @transform_3, window_bounds = array<i64: 800, 120>}, {pipeline_mode = #tpu.pipeline_mode<synchronous>, transform_indices = @transform_4, window_bounds = array<i64: 1, 120>}, {pipeline_mode = #tpu.pipeline_mode<synchronous>, transform_indices = @transform_5, window_bounds = array<i64: 120, 84>}, {pipeline_mode = #tpu.pipeline_mode<synchronous>, transform_indices = @transform_6, window_bounds = array<i64: 1, 84>}, {pipeline_mode = #tpu.pipeline_mode<synchronous>, transform_indices = @transform_7, window_bounds = array<i64: 84, 10>}, {pipeline_mode = #tpu.pipeline_mode<synchronous>, transform_indices = @transform_8, window_bounds = array<i64: 1, 10>}, {transform_indices = @transform_9, window_bounds = array<i64: 2, 10>}]} {
    %c0 = arith.constant 0 : index
    %c0_0 = arith.constant 0 : index
    %c0_1 = arith.constant 0 : index
    %0 = vector.load %arg1[%c0, %c0_0, %c0_1] : memref<1x200x400xbf16, #tpu.memory_space<vmem>>, vector<1x200x400xbf16>
    %1 = vector.shape_cast %0 : vector<1x200x400xbf16> to vector<200x400xbf16>
    %c0_2 = arith.constant 0 : index
    %c0_3 = arith.constant 0 : index
    %2 = vector.load %arg2[%c0_2, %c0_3] : memref<400x32xbf16, #tpu.memory_space<vmem>>, vector<400x32xbf16>
    %cst = arith.constant dense<0.000000e+00> : vector<200x32xf32>
    %3 = tpu.matmul %1, %2, %cst {dimension_numbers = #tpu.dot_dimension_numbers<[1], [0], [0], [1], [0, 0, 1, 1], [], []>} : vector<200x400xbf16>, vector<400x32xbf16>, vector<200x32xf32> -> vector<200x32xf32>
    %4 = vector.extract_strided_slice %3 {offsets = [0, 0], sizes = [50, 32], strides = [1, 1]} : vector<200x32xf32> to vector<50x32xf32>
    %5 = vector.extract_strided_slice %3 {offsets = [50, 0], sizes = [50, 32], strides = [1, 1]} : vector<200x32xf32> to vector<50x32xf32>
    %6 = arith.maximumf %4, %5 : vector<50x32xf32>
    %7 = vector.extract_strided_slice %3 {offsets = [100, 0], sizes = [50, 32], strides = [1, 1]} : vector<200x32xf32> to vector<50x32xf32>
    %8 = vector.extract_strided_slice %3 {offsets = [150, 0], sizes = [50, 32], strides = [1, 1]} : vector<200x32xf32> to vector<50x32xf32>
    %9 = arith.maximumf %7, %8 : vector<50x32xf32>
    %10 = arith.maximumf %6, %9 : vector<50x32xf32>
    %c0_4 = arith.constant 0 : index
    %c0_5 = arith.constant 0 : index
    %11 = vector.load %arg3[%c0_4, %c0_5] : memref<1x32xf32, #tpu.memory_space<vmem>>, vector<1x32xf32>
    %12 = vector.broadcast %11 : vector<1x32xf32> to vector<50x32xf32>
    %13 = arith.addf %10, %12 : vector<50x32xf32>
    %cst_6 = arith.constant 0.000000e+00 : f32
    %14 = vector.broadcast %cst_6 : f32 to vector<50x32xf32>
    %15 = arith.maximumf %13, %14 : vector<50x32xf32>
    %16 = vector.extract_strided_slice %15 {offsets = [0, 0], sizes = [2, 32], strides = [1, 1]} : vector<50x32xf32> to vector<2x32xf32>
    %17 = vector.extract_strided_slice %15 {offsets = [2, 0], sizes = [2, 32], strides = [1, 1]} : vector<50x32xf32> to vector<2x32xf32>
    %18 = vector.extract_strided_slice %15 {offsets = [4, 0], sizes = [2, 32], strides = [1, 1]} : vector<50x32xf32> to vector<2x32xf32>
    %19 = vector.extract_strided_slice %15 {offsets = [6, 0], sizes = [2, 32], strides = [1, 1]} : vector<50x32xf32> to vector<2x32xf32>
    %20 = vector.extract_strided_slice %15 {offsets = [8, 0], sizes = [2, 32], strides = [1, 1]} : vector<50x32xf32> to vector<2x32xf32>
    %21 = vector.extract_strided_slice %15 {offsets = [10, 0], sizes = [2, 32], strides = [1, 1]} : vector<50x32xf32> to vector<2x32xf32>
    %22 = vector.extract_strided_slice %15 {offsets = [12, 0], sizes = [2, 32], strides = [1, 1]} : vector<50x32xf32> to vector<2x32xf32>
    %23 = vector.extract_strided_slice %15 {offsets = [14, 0], sizes = [2, 32], strides = [1, 1]} : vector<50x32xf32> to vector<2x32xf32>
    %24 = vector.extract_strided_slice %15 {offsets = [16, 0], sizes = [2, 32], strides = [1, 1]} : vector<50x32xf32> to vector<2x32xf32>
    %25 = vector.extract_strided_slice %15 {offsets = [18, 0], sizes = [2, 32], strides = [1, 1]} : vector<50x32xf32> to vector<2x32xf32>
    %26 = vector.extract_strided_slice %15 {offsets = [20, 0], sizes = [2, 32], strides = [1, 1]} : vector<50x32xf32> to vector<2x32xf32>
    %27 = vector.extract_strided_slice %15 {offsets = [22, 0], sizes = [2, 32], strides = [1, 1]} : vector<50x32xf32> to vector<2x32xf32>
    %28 = vector.extract_strided_slice %15 {offsets = [24, 0], sizes = [2, 32], strides = [1, 1]} : vector<50x32xf32> to vector<2x32xf32>
    %29 = vector.extract_strided_slice %15 {offsets = [26, 0], sizes = [2, 32], strides = [1, 1]} : vector<50x32xf32> to vector<2x32xf32>
    %30 = vector.extract_strided_slice %15 {offsets = [28, 0], sizes = [2, 32], strides = [1, 1]} : vector<50x32xf32> to vector<2x32xf32>
    %31 = vector.extract_strided_slice %15 {offsets = [30, 0], sizes = [2, 32], strides = [1, 1]} : vector<50x32xf32> to vector<2x32xf32>
    %32 = vector.extract_strided_slice %15 {offsets = [32, 0], sizes = [2, 32], strides = [1, 1]} : vector<50x32xf32> to vector<2x32xf32>
    %33 = vector.extract_strided_slice %15 {offsets = [34, 0], sizes = [2, 32], strides = [1, 1]} : vector<50x32xf32> to vector<2x32xf32>
    %34 = vector.extract_strided_slice %15 {offsets = [36, 0], sizes = [2, 32], strides = [1, 1]} : vector<50x32xf32> to vector<2x32xf32>
    %35 = vector.extract_strided_slice %15 {offsets = [38, 0], sizes = [2, 32], strides = [1, 1]} : vector<50x32xf32> to vector<2x32xf32>
    %36 = vector.extract_strided_slice %15 {offsets = [40, 0], sizes = [2, 32], strides = [1, 1]} : vector<50x32xf32> to vector<2x32xf32>
    %37 = vector.extract_strided_slice %15 {offsets = [42, 0], sizes = [2, 32], strides = [1, 1]} : vector<50x32xf32> to vector<2x32xf32>
    %38 = vector.extract_strided_slice %15 {offsets = [44, 0], sizes = [2, 32], strides = [1, 1]} : vector<50x32xf32> to vector<2x32xf32>
    %39 = vector.extract_strided_slice %15 {offsets = [46, 0], sizes = [2, 32], strides = [1, 1]} : vector<50x32xf32> to vector<2x32xf32>
    %40 = vector.extract_strided_slice %15 {offsets = [48, 0], sizes = [2, 32], strides = [1, 1]} : vector<50x32xf32> to vector<2x32xf32>
    %41 = tpu.concatenate %16, %17, %18, %19, %20, %21, %22, %23, %24, %25, %26, %27, %28, %29, %30, %31 in 1 : vector<2x32xf32>, vector<2x32xf32>, vector<2x32xf32>, vector<2x32xf32>, vector<2x32xf32>, vector<2x32xf32>, vector<2x32xf32>, vector<2x32xf32>, vector<2x32xf32>, vector<2x32xf32>, vector<2x32xf32>, vector<2x32xf32>, vector<2x32xf32>, vector<2x32xf32>, vector<2x32xf32>, vector<2x32xf32> -> vector<2x512xf32>
    %42 = tpu.concatenate %32, %33, %34, %35, %36, %37, %38, %39, %40 in 1 : vector<2x32xf32>, vector<2x32xf32>, vector<2x32xf32>, vector<2x32xf32>, vector<2x32xf32>, vector<2x32xf32>, vector<2x32xf32>, vector<2x32xf32>, vector<2x32xf32> -> vector<2x288xf32>
    %43 = tpu.concatenate %41, %42 in 1 : vector<2x512xf32>, vector<2x288xf32> -> vector<2x800xf32>
    %44 = arith.truncf %43 : vector<2x800xf32> to vector<2x800xbf16>
    %c0_7 = arith.constant 0 : index
    %c0_8 = arith.constant 0 : index
    %45 = vector.load %arg4[%c0_7, %c0_8] : memref<800x120xbf16, #tpu.memory_space<vmem>>, vector<800x120xbf16>
    %cst_9 = arith.constant dense<0.000000e+00> : vector<2x120xf32>
    %46 = tpu.matmul %44, %45, %cst_9 {dimension_numbers = #tpu.dot_dimension_numbers<[1], [0], [0], [1], [0, 0, 1, 1], [], []>} : vector<2x800xbf16>, vector<800x120xbf16>, vector<2x120xf32> -> vector<2x120xf32>
    %c0_10 = arith.constant 0 : index
    %c0_11 = arith.constant 0 : index
    %47 = vector.load %arg5[%c0_10, %c0_11] : memref<1x120xf32, #tpu.memory_space<vmem>>, vector<1x120xf32>
    %48 = vector.broadcast %47 : vector<1x120xf32> to vector<2x120xf32>
    %49 = arith.addf %46, %48 : vector<2x120xf32>
    %cst_12 = arith.constant 0.000000e+00 : f32
    %50 = vector.broadcast %cst_12 : f32 to vector<2x120xf32>
    %51 = arith.maximumf %49, %50 : vector<2x120xf32>
    %52 = arith.truncf %51 : vector<2x120xf32> to vector<2x120xbf16>
    %c0_13 = arith.constant 0 : index
    %c0_14 = arith.constant 0 : index
    %53 = vector.load %arg6[%c0_13, %c0_14] : memref<120x84xbf16, #tpu.memory_space<vmem>>, vector<120x84xbf16>
    %cst_15 = arith.constant dense<0.000000e+00> : vector<2x84xf32>
    %54 = tpu.matmul %52, %53, %cst_15 {dimension_numbers = #tpu.dot_dimension_numbers<[1], [0], [0], [1], [0, 0, 1, 1], [], []>} : vector<2x120xbf16>, vector<120x84xbf16>, vector<2x84xf32> -> vector<2x84xf32>
    %c0_16 = arith.constant 0 : index
    %c0_17 = arith.constant 0 : index
    %55 = vector.load %arg7[%c0_16, %c0_17] : memref<1x84xf32, #tpu.memory_space<vmem>>, vector<1x84xf32>
    %56 = vector.broadcast %55 : vector<1x84xf32> to vector<2x84xf32>
    %57 = arith.addf %54, %56 : vector<2x84xf32>
    %cst_18 = arith.constant 0.000000e+00 : f32
    %58 = vector.broadcast %cst_18 : f32 to vector<2x84xf32>
    %59 = arith.maximumf %57, %58 : vector<2x84xf32>
    %60 = arith.truncf %59 : vector<2x84xf32> to vector<2x84xbf16>
    %c0_19 = arith.constant 0 : index
    %c0_20 = arith.constant 0 : index
    %61 = vector.load %arg8[%c0_19, %c0_20] : memref<84x10xbf16, #tpu.memory_space<vmem>>, vector<84x10xbf16>
    %cst_21 = arith.constant dense<0.000000e+00> : vector<2x10xf32>
    %62 = tpu.matmul %60, %61, %cst_21 {dimension_numbers = #tpu.dot_dimension_numbers<[1], [0], [0], [1], [0, 0, 1, 1], [], []>} : vector<2x84xbf16>, vector<84x10xbf16>, vector<2x10xf32> -> vector<2x10xf32>
    %c0_22 = arith.constant 0 : index
    %c0_23 = arith.constant 0 : index
    %63 = vector.load %arg9[%c0_22, %c0_23] : memref<1x10xf32, #tpu.memory_space<vmem>>, vector<1x10xf32>
    %64 = vector.broadcast %63 : vector<1x10xf32> to vector<2x10xf32>
    %65 = arith.addf %62, %64 : vector<2x10xf32>
    %c0_24 = arith.constant 0 : index
    %c0_25 = arith.constant 0 : index
    %66 = vector.load %arg10[%c0_24, %c0_25] : memref<2x10xf32, #tpu.memory_space<vmem>>, vector<2x10xf32>
    tpu.vector_store %arg10[%c0_24, %c0_25], %65 {strides = array<i32>} : memref<2x10xf32, #tpu.memory_space<vmem>>, vector<2x10xf32>,
    return
  }
  func.func @transform_0(%arg0: i32) -> (i32, i32, i32) {
    %c0_i32 = arith.constant 0 : i32
    %c0_i32_0 = arith.constant 0 : i32
    %c0_i32_1 = arith.constant 0 : i32
    return %arg0, %c0_i32, %c0_i32_0 : i32, i32, i32
  }
  func.func @transform_1(%arg0: i32) -> (i32, i32) {
    %c0_i32 = arith.constant 0 : i32
    %c0_i32_0 = arith.constant 0 : i32
    %c0_i32_1 = arith.constant 0 : i32
    return %c0_i32, %c0_i32_0 : i32, i32
  }
  func.func @transform_2(%arg0: i32) -> (i32, i32) {
    %c0_i32 = arith.constant 0 : i32
    %c0_i32_0 = arith.constant 0 : i32
    %c0_i32_1 = arith.constant 0 : i32
    return %c0_i32, %c0_i32_0 : i32, i32
  }
  func.func @transform_3(%arg0: i32) -> (i32, i32) {
    %c0_i32 = arith.constant 0 : i32
    %c0_i32_0 = arith.constant 0 : i32
    %c0_i32_1 = arith.constant 0 : i32
    return %c0_i32, %c0_i32_0 : i32, i32
  }
  func.func @transform_4(%arg0: i32) -> (i32, i32) {
    %c0_i32 = arith.constant 0 : i32
    %c0_i32_0 = arith.constant 0 : i32
    %c0_i32_1 = arith.constant 0 : i32
    return %c0_i32, %c0_i32_0 : i32, i32
  }
  func.func @transform_5(%arg0: i32) -> (i32, i32) {
    %c0_i32 = arith.constant 0 : i32
    %c0_i32_0 = arith.constant 0 : i32
    %c0_i32_1 = arith.constant 0 : i32
    return %c0_i32, %c0_i32_0 : i32, i32
  }
  func.func @transform_6(%arg0: i32) -> (i32, i32) {
    %c0_i32 = arith.constant 0 : i32
    %c0_i32_0 = arith.constant 0 : i32
    %c0_i32_1 = arith.constant 0 : i32
    return %c0_i32, %c0_i32_0 : i32, i32
  }
  func.func @transform_7(%arg0: i32) -> (i32, i32) {
    %c0_i32 = arith.constant 0 : i32
    %c0_i32_0 = arith.constant 0 : i32
    %c0_i32_1 = arith.constant 0 : i32
    return %c0_i32, %c0_i32_0 : i32, i32
  }
  func.func @transform_8(%arg0: i32) -> (i32, i32) {
    %c0_i32 = arith.constant 0 : i32
    %c0_i32_0 = arith.constant 0 : i32
    %c0_i32_1 = arith.constant 0 : i32
    return %c0_i32, %c0_i32_0 : i32, i32
  }
  func.func @transform_9(%arg0: i32) -> (i32, i32) {
    %c0_i32 = arith.constant 0 : i32
    %c0_i32_0 = arith.constant 0 : i32
    return %arg0, %c0_i32 : i32, i32
  }
}

</mosaic_0001>

<bundles_post_ra>
// kernel: quantized_cnn_forward.2
= control target key start
LH: loop header
LB: loop body
LE: loop exit
PB: predicated region body
PF: predicated region fallthrough
CT: control target
= control target key end

     0   :  { %vm1035_vm0 = vcmask 1044480   ;;  %vm1036_vm1 = vcmask 1045504   ;;  %v3085_v1 = vmov 65535   ;;  %vm740_vm2 = vcmask 613376   ;;  %s4063_s1 = inlined_call_operand.vmem [shape: bf16[75,16], index: 1, kind: input, shape index: {}]   ;;  %s4064_s0 = inlined_call_operand.vmem [shape: bf16[1,1568,75], index: 0, kind: input, shape index: {}]   ;;  %s4065_s2 = inlined_call_operand.vmem [shape: f32[1,16], index: 2, kind: input, shape index: {}]   ;;  %s4066_s3 = inlined_call_operand.vmem [shape: bf16[392,16], index: 3, kind: output, shape index: {}]  }
   0x1   :  { %v2982_v0 = vld [vmem:[%s4063_s1 + $0x20] sm:$0x3f]   ;;  %v1037_v2 = vsel %vm1035_vm0, 4294967295, %v3085_v1  ;;  %v2983_v5 = vld [vmem:[%s4063_s1 + $0x18] sm:$0xff]   ;;  %v2988_v7 = vld [vmem:[%s4064_s0 + $0x190] sm:$0xff]   ;;  %vm2308_vm3 = vcmask 125952  }
   0x2   :  { %v1038_v3 = vsel %vm1036_vm1, %v1037_v2, 0  ;;  %v2987_v6 = vld [vmem:[%s4064_s0] sm:$0xff]   ;;  %v2984_v8 = vld [vmem:[%s4063_s1 + $0x10] sm:$0xff]   ;;  %2875 = vmatprep.mubr.msk.bf16.mxu1 %vm740_vm2, %v2988_v7  ;;  %v2985_v9 = vld [vmem:[%s4063_s1 + $0x8] sm:$0xff]  }
   0x3   :  { %v1040_v4 = vand.u32 %v2982_v0, %v1038_v3  ;;  %2775 = vmatprep.mubr.msk.bf16.mxu0 %vm740_vm2, %v2987_v6  ;;  %v2986_v10 = vld [vmem:[%s4063_s1] sm:$0xff]   ;;  %v2989_v11 = vld [vmem:[%s4064_s0 + $0x8] sm:$0xff]   ;;  %v2990_v12 = vld [vmem:[%s4064_s0 + $0x198] sm:$0xff]  }
   0x4   :  { %v2991_v13 = vld [vmem:[%s4064_s0 + $0x10] sm:$0xff]   ;;  %v2992_v14 = vld [vmem:[%s4064_s0 + $0x1a0] sm:$0xff]   ;;  %v2993_v15 = vld [vmem:[%s4064_s0 + $0x18] sm:$0xff]  }
   0x5   :  { %2765 = vmatprep.subr.bf16.mxu0 %v1040_v4  ;;  %2971 = vmatprep.subr.bf16.mxu1 %v1040_v4  ;;  %v2994_v16 = vld [vmem:[%s4064_s0 + $0x1a8] sm:$0xff]   ;;  %v2995_v17 = vld [vmem:[%s4064_s0 + $0x20] sm:$0xff]   ;;  %v2996_v18 = vld [vmem:[%s4064_s0 + $0x1b0] sm:$0xff]  }
   0x6   :  { %2766 = vmatpush3.bf16.msra.mxu0 %v1040_v4  ;;  %2976 = vmatpush3.bf16.msra.mxu1 %v1040_v4  ;;  %v2997_v19 = vld [vmem:[%s4064_s0 + $0x28] sm:$0xff]   ;;  %v2998_v20 = vld [vmem:[%s4064_s0 + $0x1b8] sm:$0xff]   ;;  %v2999_v21 = vld [vmem:[%s4064_s0 + $0x30] sm:$0xff]  }
   0x7   :  { %2767 = vmatprep.subr.bf16.mxu0 %v2983_v5  ;;  %2972 = vmatprep.subr.bf16.mxu1 %v2983_v5  ;;  %v3000_v22 = vld [vmem:[%s4064_s0 + $0x1c0] sm:$0xff]   ;;  %v3001_v23 = vld [vmem:[%s4064_s0 + $0x38] sm:$0xff]   ;;  %v3002_v24 = vld [vmem:[%s4064_s0 + $0x1c8] sm:$0xff]  }
   0x8   :  { %v3003_v25 = vld [vmem:[%s4064_s0 + $0x40] sm:$0xff]   ;;  %v3004_v26 = vld [vmem:[%s4064_s0 + $0x1d0] sm:$0xff]   ;;  %v3005_v27 = vld [vmem:[%s4064_s0 + $0x48] sm:$0xff]  }
   0x9   :  { %v3006_v28 = vld [vmem:[%s4064_s0 + $0x1d8] sm:$0xff]   ;;  %v3007_v29 = vld [vmem:[%s4064_s0 + $0x50] sm:$0xff]   ;;  %v3008_v30 = vld [vmem:[%s4064_s0 + $0x1e0] sm:$0xff]  }
   0xa   :  { %2768 = vmatpush3.bf16.msra.mxu0 %v2983_v5  ;;  %2977 = vmatpush3.bf16.msra.mxu1 %v2983_v5  ;;  %v3009_v31 = vld [vmem:[%s4064_s0 + $0x58] sm:$0xff]   ;;  %v3010_v32 = vld [vmem:[%s4064_s0 + $0x1e8] sm:$0xff]   ;;  %v3011_v33 = vld [vmem:[%s4064_s0 + $0x60] sm:$0xff]  }
   0xb   :  { %2769 = vmatprep.subr.bf16.mxu0 %v2984_v8  ;;  %2973 = vmatprep.subr.bf16.mxu1 %v2984_v8  ;;  %v3012_v34 = vld [vmem:[%s4064_s0 + $0x1f0] sm:$0xff]   ;;  %v3013_v35 = vld [vmem:[%s4064_s0 + $0x68] sm:$0xff]   ;;  %v3014_v36 = vld [vmem:[%s4064_s0 + $0x1f8] sm:$0xff]  }
   0xc   :  { %v3015_v37 = vld [vmem:[%s4064_s0 + $0x70] sm:$0xff]   ;;  %v3016_v38 = vld [vmem:[%s4064_s0 + $0x200] sm:$0xff]   ;;  %v3017_v39 = vld [vmem:[%s4064_s0 + $0x78] sm:$0xff]  }
   0xd   :  { %v3018_v40 = vld [vmem:[%s4064_s0 + $0x208] sm:$0xff]   ;;  %v3019_v41 = vld [vmem:[%s4064_s0 + $0x80] sm:$0xff]   ;;  %v3020_v42 = vld [vmem:[%s4064_s0 + $0x210] sm:$0xff]  }
   0xe   :  { %2770 = vmatpush3.bf16.msra.mxu0 %v2984_v8  ;;  %2978 = vmatpush3.bf16.msra.mxu1 %v2984_v8  ;;  %v3021_v43 = vld [vmem:[%s4064_s0 + $0x88] sm:$0xff]   ;;  %v3022_v44 = vld [vmem:[%s4064_s0 + $0x218] sm:$0xff]   ;;  %v3023_v45 = vld [vmem:[%s4064_s0 + $0x90] sm:$0xff]  }
   0xf   :  { %2771 = vmatprep.subr.bf16.mxu0 %v2985_v9  ;;  %2974 = vmatprep.subr.bf16.mxu1 %v2985_v9  ;;  %v3024_v46 = vld [vmem:[%s4064_s0 + $0x220] sm:$0xff]   ;;  %v3025_v47 = vld [vmem:[%s4064_s0 + $0x98] sm:$0xff]   ;;  %v3026_v48 = vld [vmem:[%s4064_s0 + $0x228] sm:$0xff]  }
  0x10   :  { %v3027_v49 = vld [vmem:[%s4064_s0 + $0xa0] sm:$0xff]   ;;  %v3028_v50 = vld [vmem:[%s4064_s0 + $0x230] sm:$0xff]   ;;  %v3029_v51 = vld [vmem:[%s4064_s0 + $0xa8] sm:$0xff]  }
  0x11   :  { %v3030_v52 = vld [vmem:[%s4064_s0 + $0x238] sm:$0xff]   ;;  %v3031_v53 = vld [vmem:[%s4064_s0 + $0xb0] sm:$0xff]   ;;  %v3032_v54 = vld [vmem:[%s4064_s0 + $0x240] sm:$0xff]  }
  0x12   :  { %2772 = vmatpush3.bf16.msra.mxu0 %v2985_v9  ;;  %2979 = vmatpush3.bf16.msra.mxu1 %v2985_v9  ;;  %v3033_v55 = vld [vmem:[%s4064_s0 + $0xb8] sm:$0xff]   ;;  %v3034_v56 = vld [vmem:[%s4064_s0 + $0x248] sm:$0xff]   ;;  %v3035_v57 = vld [vmem:[%s4064_s0 + $0xc0] sm:$0xff]  }
  0x13   :  { %2773 = vmatprep.subr.bf16.mxu0 %v2986_v10  ;;  %2975 = vmatprep.subr.bf16.mxu1 %v2986_v10  ;;  %v3036_v58 = vld [vmem:[%s4064_s0 + $0x250] sm:$0xff]   ;;  %v3037_v59 = vld [vmem:[%s4064_s0 + $0xc8] sm:$0xff]   ;;  %v3038_v60 = vld [vmem:[%s4064_s0 + $0x258] sm:$0xff]  }
  0x14   :  { %v3039_v61 = vld [vmem:[%s4064_s0 + $0xd0] sm:$0xff]   ;;  %v3040_v62 = vld [vmem:[%s4064_s0 + $0x260] sm:$0xff]   ;;  %v3041_v63 = vld [vmem:[%s4064_s0 + $0xd8] sm:$0xff]  }
  0x15   :  { %v3042_v0 = vld [vmem:[%s4064_s0 + $0x268] sm:$0xff]   ;;  %v3043_v1 = vld [vmem:[%s4064_s0 + $0xe0] sm:$0xff]   ;;  %v3044_v2 = vld [vmem:[%s4064_s0 + $0x270] sm:$0xff]  }
  0x16   :  { %2774 = vmatpush3.bf16.msra.mxu0 %v2986_v10  ;;  %2980 = vmatpush3.bf16.msra.mxu1 %v2986_v10  ;;  %v3045_v3 = vld [vmem:[%s4064_s0 + $0xe8] sm:$0xff]   ;;  %v3046_v4 = vld [vmem:[%s4064_s0 + $0x278] sm:$0xff]   ;;  %v3047_v5 = vld [vmem:[%s4064_s0 + $0xf0] sm:$0xff]  }
  0x17   :  { %v3048_v6 = vld [vmem:[%s4064_s0 + $0x280] sm:$0xff]   ;;  %v3049_v7 = vld [vmem:[%s4064_s0 + $0xf8] sm:$0xff]   ;;  %v3050_v8 = vld [vmem:[%s4064_s0 + $0x288] sm:$0xff]  }
  0x18   :  { %v3051_v9 = vld [vmem:[%s4064_s0 + $0x100] sm:$0xff]   ;;  %v3052_v10 = vld [vmem:[%s4064_s0 + $0x290] sm:$0xff]  }
  0x19   :  { %2776 = vmatmul.mubr.msk.bf16.vlgmr.msra.gmra.mxu0 %vm740_vm2, %v2989_v11  ;;  %2876 = vmatmul.mubr.msk.bf16.vlgmr.msra.gmra.mxu1 %vm740_vm2, %v2990_v12  ;;  %v3053_v11 = vld [vmem:[%s4064_s0 + $0x108] sm:$0xff]   ;;  %v3054_v12 = vld [vmem:[%s4064_s0 + $0x298] sm:$0xff]  }
  0x1a   :  { %2779 = vmatprep.mubr.msk.bf16.mxu0 %vm740_vm2, %v2991_v13  ;;  %2879 = vmatprep.mubr.msk.bf16.mxu1 %vm740_vm2, %v2992_v14  ;;  %v3055_v13 = vld [vmem:[%s4064_s0 + $0x110] sm:$0xff]   ;;  %v3056_v14 = vld [vmem:[%s4064_s0 + $0x2a0] sm:$0xff]  }
  0x21   :  { %2780 = vmatmul.mubr.msk.bf16.gmra.mxu0 %vm740_vm2, %v2993_v15  ;;  %2880 = vmatmul.mubr.msk.bf16.gmra.mxu1 %vm740_vm2, %v2994_v16  ;;  %v3057_v15 = vld [vmem:[%s4064_s0 + $0x118] sm:$0xff]   ;;  %v3058_v16 = vld [vmem:[%s4064_s0 + $0x2a8] sm:$0xff]  }
  0x22   :  { %2783 = vmatprep.mubr.msk.bf16.mxu0 %vm740_vm2, %v2995_v17  ;;  %2883 = vmatprep.mubr.msk.bf16.mxu1 %vm740_vm2, %v2996_v18  ;;  %v3059_v17 = vld [vmem:[%s4064_s0 + $0x120] sm:$0xff]   ;;  %v3060_v18 = vld [vmem:[%s4064_s0 + $0x2b0] sm:$0xff]  }
  0x29   :  { %2784 = vmatmul.mubr.msk.bf16.gmra.mxu0 %vm740_vm2, %v2997_v19  ;;  %2884 = vmatmul.mubr.msk.bf16.gmra.mxu1 %vm740_vm2, %v2998_v20  ;;  %v3061_v19 = vld [vmem:[%s4064_s0 + $0x128] sm:$0xff]   ;;  %v3062_v20 = vld [vmem:[%s4064_s0 + $0x2b8] sm:$0xff]  }
  0x2a   :  { %2787 = vmatprep.mubr.msk.bf16.mxu0 %vm740_vm2, %v2999_v21  ;;  %2887 = vmatprep.mubr.msk.bf16.mxu1 %vm740_vm2, %v3000_v22  ;;  %v3063_v21 = vld [vmem:[%s4064_s0 + $0x130] sm:$0xff]   ;;  %v3064_v22 = vld [vmem:[%s4064_s0 + $0x2c0] sm:$0xff]  }
  0x31   :  { %2788 = vmatmul.mubr.msk.bf16.gmra.mxu0 %vm740_vm2, %v3001_v23  ;;  %2888 = vmatmul.mubr.msk.bf16.gmra.mxu1 %vm740_vm2, %v3002_v24  ;;  %v3065_v23 = vld [vmem:[%s4064_s0 + $0x138] sm:$0xff]   ;;  %v3066_v24 = vld [vmem:[%s4064_s0 + $0x2c8] sm:$0xff]  }
  0x32   :  { %2791 = vmatprep.mubr.msk.bf16.mxu0 %vm740_vm2, %v3003_v25  ;;  %2891 = vmatprep.mubr.msk.bf16.mxu1 %vm740_vm2, %v3004_v26  ;;  %v3067_v25 = vld [vmem:[%s4064_s0 + $0x140] sm:$0xff]   ;;  %v3068_v26 = vld [vmem:[%s4064_s0 + $0x2d0] sm:$0xff]  }
  0x39   :  { %2792 = vmatmul.mubr.msk.bf16.gmra.mxu0 %vm740_vm2, %v3005_v27  ;;  %2892 = vmatmul.mubr.msk.bf16.gmra.mxu1 %vm740_vm2, %v3006_v28  ;;  %v3069_v27 = vld [vmem:[%s4064_s0 + $0x148] sm:$0xff]   ;;  %v3070_v28 = vld [vmem:[%s4064_s0 + $0x2d8] sm:$0xff]  }
  0x3a   :  { %2795 = vmatprep.mubr.msk.bf16.mxu0 %vm740_vm2, %v3007_v29  ;;  %2895 = vmatprep.mubr.msk.bf16.mxu1 %vm740_vm2, %v3008_v30  ;;  %v3071_v29 = vld [vmem:[%s4064_s0 + $0x150] sm:$0xff]   ;;  %v3072_v30 = vld [vmem:[%s4064_s0 + $0x2e0] sm:$0xff]  }
  0x41   :  { %2796 = vmatmul.mubr.msk.bf16.gmra.mxu0 %vm740_vm2, %v3009_v31  ;;  %2896 = vmatmul.mubr.msk.bf16.gmra.mxu1 %vm740_vm2, %v3010_v32  ;;  %v3073_v31 = vld [vmem:[%s4064_s0 + $0x158] sm:$0xff]   ;;  %v3074_v32 = vld [vmem:[%s4064_s0 + $0x2e8] sm:$0xff]  }
  0x42   :  { %2799 = vmatprep.mubr.msk.bf16.mxu0 %vm740_vm2, %v3011_v33  ;;  %2899 = vmatprep.mubr.msk.bf16.mxu1 %vm740_vm2, %v3012_v34  ;;  %v3075_v33 = vld [vmem:[%s4064_s0 + $0x160] sm:$0xff]   ;;  %v3076_v34 = vld [vmem:[%s4064_s0 + $0x2f0] sm:$0xff]  }
  0x49   :  { %2800 = vmatmul.mubr.msk.bf16.gmra.mxu0 %vm740_vm2, %v3013_v35  ;;  %2900 = vmatmul.mubr.msk.bf16.gmra.mxu1 %vm740_vm2, %v3014_v36  ;;  %v3077_v35 = vld [vmem:[%s4064_s0 + $0x168] sm:$0xff]   ;;  %v3078_v36 = vld [vmem:[%s4064_s0 + $0x2f8] sm:$0xff]  }
  0x4a   :  { %2803 = vmatprep.mubr.msk.bf16.mxu0 %vm740_vm2, %v3015_v37  ;;  %2903 = vmatprep.mubr.msk.bf16.mxu1 %vm740_vm2, %v3016_v38  ;;  %v3079_v37 = vld [vmem:[%s4064_s0 + $0x170] sm:$0xff]   ;;  %v3080_v38 = vld [vmem:[%s4064_s0 + $0x300] sm:$0xff]  }
  0x51   :  { %2804 = vmatmul.mubr.msk.bf16.gmra.mxu0 %vm740_vm2, %v3017_v39  ;;  %2904 = vmatmul.mubr.msk.bf16.gmra.mxu1 %vm740_vm2, %v3018_v40  ;;  %v3081_v39 = vld [vmem:[%s4064_s0 + $0x178] sm:$0xff]   ;;  %v3082_v40 = vld [vmem:[%s4064_s0 + $0x308] sm:$0xff]  }
  0x52   :  { %2807 = vmatprep.mubr.msk.bf16.mxu0 %vm740_vm2, %v3019_v41  ;;  %2907 = vmatprep.mubr.msk.bf16.mxu1 %vm740_vm2, %v3020_v42  ;;  %v3083_v41 = vld [vmem:[%s4064_s0 + $0x180] sm:$0xff]   ;;  %v3084_v42 = vld [vmem:[%s4064_s0 + $0x188] sm:$0xff]  }
  0x59   :  { %2808 = vmatmul.mubr.msk.bf16.gmra.mxu0 %vm740_vm2, %v3021_v43  ;;  %2908 = vmatmul.mubr.msk.bf16.gmra.mxu1 %vm740_vm2, %v3022_v44 }
  0x5a   :  { %2811 = vmatprep.mubr.msk.bf16.mxu0 %vm740_vm2, %v3023_v45  ;;  %2911 = vmatprep.mubr.msk.bf16.mxu1 %vm740_vm2, %v3024_v46 }
  0x61   :  { %2812 = vmatmul.mubr.msk.bf16.gmra.mxu0 %vm740_vm2, %v3025_v47  ;;  %2912 = vmatmul.mubr.msk.bf16.gmra.mxu1 %vm740_vm2, %v3026_v48 }
  0x62   :  { %2815 = vmatprep.mubr.msk.bf16.mxu0 %vm740_vm2, %v3027_v49  ;;  %2915 = vmatprep.mubr.msk.bf16.mxu1 %vm740_vm2, %v3028_v50 }
  0x69   :  { %2816 = vmatmul.mubr.msk.bf16.gmra.mxu0 %vm740_vm2, %v3029_v51  ;;  %2916 = vmatmul.mubr.msk.bf16.gmra.mxu1 %vm740_vm2, %v3030_v52 }
  0x6a   :  { %2819 = vmatprep.mubr.msk.bf16.mxu0 %vm740_vm2, %v3031_v53  ;;  %2919 = vmatprep.mubr.msk.bf16.mxu1 %vm740_vm2, %v3032_v54 }
  0x71   :  { %2820 = vmatmul.mubr.msk.bf16.gmra.mxu0 %vm740_vm2, %v3033_v55  ;;  %2920 = vmatmul.mubr.msk.bf16.gmra.mxu1 %vm740_vm2, %v3034_v56 }
  0x72   :  { %2823 = vmatprep.mubr.msk.bf16.mxu0 %vm740_vm2, %v3035_v57  ;;  %2923 = vmatprep.mubr.msk.bf16.mxu1 %vm740_vm2, %v3036_v58 }
  0x79   :  { %2824 = vmatmul.mubr.msk.bf16.gmra.mxu0 %vm740_vm2, %v3037_v59  ;;  %2924 = vmatmul.mubr.msk.bf16.gmra.mxu1 %vm740_vm2, %v3038_v60 }
  0x7a   :  { %2827 = vmatprep.mubr.msk.bf16.mxu0 %vm740_vm2, %v3039_v61  ;;  %2927 = vmatprep.mubr.msk.bf16.mxu1 %vm740_vm2, %v3040_v62 }
  0x81   :  { %2828 = vmatmul.mubr.msk.bf16.gmra.mxu0 %vm740_vm2, %v3041_v63  ;;  %2928 = vmatmul.mubr.msk.bf16.gmra.mxu1 %vm740_vm2, %v3042_v0 }
  0x82   :  { %2831 = vmatprep.mubr.msk.bf16.mxu0 %vm740_vm2, %v3043_v1  ;;  %2931 = vmatprep.mubr.msk.bf16.mxu1 %vm740_vm2, %v3044_v2 }
  0x89   :  { %2832 = vmatmul.mubr.msk.bf16.gmra.mxu0 %vm740_vm2, %v3045_v3  ;;  %2932 = vmatmul.mubr.msk.bf16.gmra.mxu1 %vm740_vm2, %v3046_v4 }
  0x8a   :  { %2835 = vmatprep.mubr.msk.bf16.mxu0 %vm740_vm2, %v3047_v5  ;;  %2935 = vmatprep.mubr.msk.bf16.mxu1 %vm740_vm2, %v3048_v6 }
  0x91   :  { %2836 = vmatmul.mubr.msk.bf16.gmra.mxu0 %vm740_vm2, %v3049_v7  ;;  %2936 = vmatmul.mubr.msk.bf16.gmra.mxu1 %vm740_vm2, %v3050_v8 }
  0x92   :  { %2839 = vmatprep.mubr.msk.bf16.mxu0 %vm740_vm2, %v3051_v9  ;;  %2939 = vmatprep.mubr.msk.bf16.mxu1 %vm740_vm2, %v3052_v10 }
  0x99   :  { %2840 = vmatmul.mubr.msk.bf16.gmra.mxu0 %vm740_vm2, %v3053_v11  ;;  %2940 = vmatmul.mubr.msk.bf16.gmra.mxu1 %vm740_vm2, %v3054_v12 }
  0x9a   :  { %2843 = vmatprep.mubr.msk.bf16.mxu0 %vm740_vm2, %v3055_v13  ;;  %2943 = vmatprep.mubr.msk.bf16.mxu1 %vm740_vm2, %v3056_v14 }
  0xa1   :  { %2844 = vmatmul.mubr.msk.bf16.gmra.mxu0 %vm740_vm2, %v3057_v15  ;;  %2944 = vmatmul.mubr.msk.bf16.gmra.mxu1 %vm740_vm2, %v3058_v16 }
  0xa2   :  { %2847 = vmatprep.mubr.msk.bf16.mxu0 %vm740_vm2, %v3059_v17  ;;  %2947 = vmatprep.mubr.msk.bf16.mxu1 %vm740_vm2, %v3060_v18 }
  0xa9   :  { %2848 = vmatmul.mubr.msk.bf16.gmra.mxu0 %vm740_vm2, %v3061_v19  ;;  %2948 = vmatmul.mubr.msk.bf16.gmra.mxu1 %vm740_vm2, %v3062_v20 }
  0xaa   :  { %2851 = vmatprep.mubr.msk.bf16.mxu0 %vm740_vm2, %v3063_v21  ;;  %2951 = vmatprep.mubr.msk.bf16.mxu1 %vm740_vm2, %v3064_v22 }
  0xb1   :  { %2852 = vmatmul.mubr.msk.bf16.gmra.mxu0 %vm740_vm2, %v3065_v23  ;;  %2952 = vmatmul.mubr.msk.bf16.gmra.mxu1 %vm740_vm2, %v3066_v24 }
  0xb2   :  { %2855 = vmatprep.mubr.msk.bf16.mxu0 %vm740_vm2, %v3067_v25  ;;  %2955 = vmatprep.mubr.msk.bf16.mxu1 %vm740_vm2, %v3068_v26 }
  0xb9   :  { %2856 = vmatmul.mubr.msk.bf16.gmra.mxu0 %vm740_vm2, %v3069_v27  ;;  %2956 = vmatmul.mubr.msk.bf16.gmra.mxu1 %vm740_vm2, %v3070_v28 }
  0xba   :  { %2859 = vmatprep.mubr.msk.bf16.mxu0 %vm740_vm2, %v3071_v29  ;;  %2959 = vmatprep.mubr.msk.bf16.mxu1 %vm740_vm2, %v3072_v30 }
  0xc1   :  { %2860 = vmatmul.mubr.msk.bf16.gmra.mxu0 %vm740_vm2, %v3073_v31  ;;  %2960 = vmatmul.mubr.msk.bf16.gmra.mxu1 %vm740_vm2, %v3074_v32 }
  0xc2   :  { %2863 = vmatprep.mubr.msk.bf16.mxu0 %vm740_vm2, %v3075_v33  ;;  %2963 = vmatprep.mubr.msk.bf16.mxu1 %vm740_vm2, %v3076_v34 }
  0xc9   :  { %2864 = vmatmul.mubr.msk.bf16.gmra.mxu0 %vm740_vm2, %v3077_v35  ;;  %2964 = vmatmul.mubr.msk.bf16.gmra.mxu1 %vm740_vm2, %v3078_v36 }
  0xca   :  { %2867 = vmatprep.mubr.msk.bf16.mxu0 %vm740_vm2, %v3079_v37  ;;  %2967 = vmatprep.mubr.msk.bf16.mxu1 %vm740_vm2, %v3080_v38 }
  0xd1   :  { %2868 = vmatmul.mubr.msk.bf16.gmra.mxu0 %vm740_vm2, %v3081_v39  ;;  %2968 = vmatmul.mubr.msk.bf16.gmra.mxu1 %vm740_vm2, %v3082_v40 }
  0xd2   :  { %2871 = vmatprep.mubr.msk.bf16.mxu0 %vm740_vm2, %v3083_v41 }
  0xd9   :  { %v3512_v43 = vpop.f32.mrf.mxu0  ;;  %2872 = vmatmul.mubr.msk.bf16.gmra.mxu0 %vm740_vm2, %v3084_v42  ;;  %v3515_v44 = vpop.f32.mrf.mxu1 }
  0xdb   :  { %v3517_v45 = vpop.f32.mrf.mxu0  ;;  %v3519_v46 = vpop.f32.mrf.mxu1 }
  0xdc   :  { %4067 = vst [vmem:[#allocation2_spill] sm:$0xff] %v3517_v45 }
  0xdd   :  { %v3521_v47 = vpop.f32.mrf.mxu0  ;;  %v3523_v48 = vpop.f32.mrf.mxu1 }
  0xdf   :  { %v3525_v49 = vpop.f32.mrf.mxu0  ;;  %v3527_v50 = vpop.f32.mrf.mxu1 }
  0xe0   :  { %4068 = vst [vmem:[#allocation3_spill] sm:$0xff] %v3525_v49 }
  0xe1   :  { %v3529_v51 = vpop.f32.mrf.mxu0  ;;  %v3531_v52 = vpop.f32.mrf.mxu1 }
  0xe3   :  { %v3533_v53 = vpop.f32.mrf.mxu0  ;;  %v3535_v54 = vpop.f32.mrf.mxu1 }
  0xe5   :  { %v3537_v55 = vpop.f32.mrf.mxu0  ;;  %v3539_v56 = vpop.f32.mrf.mxu1 }
  0xe7   :  { %v3541_v57 = vpop.f32.mrf.mxu0  ;;  %v3543_v58 = vpop.f32.mrf.mxu1 }
  0xe9   :  { %v3545_v59 = vpop.f32.mrf.mxu0  ;;  %v3547_v60 = vpop.f32.mrf.mxu1 }
  0xeb   :  { %v3549_v61 = vpop.f32.mrf.mxu0  ;;  %v3551_v62 = vpop.f32.mrf.mxu1 }
  0xed   :  { %v3553_v63 = vpop.f32.mrf.mxu0  ;;  %v3555_v0 = vpop.f32.mrf.mxu1 }
  0xef   :  { %v3557_v1 = vpop.f32.mrf.mxu0  ;;  %v3559_v2 = vpop.f32.mrf.mxu1 }
  0xf1   :  { %v3561_v3 = vpop.f32.mrf.mxu0  ;;  %v3563_v4 = vpop.f32.mrf.mxu1 }
  0xf3   :  { %v3565_v5 = vpop.f32.mrf.mxu0  ;;  %v3567_v6 = vpop.f32.mrf.mxu1 }
  0xf5   :  { %v3569_v7 = vpop.f32.mrf.mxu0  ;;  %v3571_v8 = vpop.f32.mrf.mxu1 }
  0xf7   :  { %v3573_v9 = vpop.f32.mrf.mxu0  ;;  %v3575_v10 = vpop.f32.mrf.mxu1 }
  0xf9   :  { %v3577_v11 = vpop.f32.mrf.mxu0  ;;  %v3579_v12 = vpop.f32.mrf.mxu1 }
  0xfb   :  { %v3581_v13 = vpop.f32.mrf.mxu0  ;;  %v3583_v14 = vpop.f32.mrf.mxu1 }
  0xfd   :  { %v3585_v15 = vpop.f32.mrf.mxu0  ;;  %v3587_v16 = vpop.f32.mrf.mxu1 }
  0xff   :  { %v3589_v17 = vpop.f32.mrf.mxu0  ;;  %v3591_v18 = vpop.f32.mrf.mxu1 }
 0x101   :  { %v3593_v19 = vpop.f32.mrf.mxu0  ;;  %v3595_v20 = vpop.f32.mrf.mxu1 }
 0x102   :  { %4069 = vst [vmem:[#allocation4_spill] sm:$0xff] %v3595_v20 }
 0x103   :  { %v3597_v21 = vpop.f32.mrf.mxu0  ;;  %v3599_v22 = vpop.f32.mrf.mxu1 }
 0x105   :  { %v3601_v23 = vpop.f32.mrf.mxu0  ;;  %v3603_v24 = vpop.f32.mrf.mxu1 }
 0x106   :  { %4070 = vst [vmem:[#allocation5_spill] sm:$0xff] %v3603_v24 }
 0x107   :  { %v3605_v25 = vpop.f32.mrf.mxu0  ;;  %v3607_v26 = vpop.f32.mrf.mxu1 }
 0x109   :  { %v3609_v27 = vpop.f32.mrf.mxu0  ;;  %v3611_v28 = vpop.f32.mrf.mxu1 }
 0x10a   :  { %4071 = vst [vmem:[#allocation6_spill] sm:$0xff] %v3609_v27  ;;  %4072 = vst [vmem:[#allocation7_spill] sm:$0xff] %v3611_v28 }
 0x10b   :  { %v3613_v29 = vpop.f32.mrf.mxu0  ;;  %v3615_v30 = vpop.f32.mrf.mxu1 }
 0x10c   :  { %4073 = vst [vmem:[#allocation8_spill] sm:$0xff] %v3613_v29  ;;  %4074 = vst [vmem:[#allocation9_spill] sm:$0xff] %v3615_v30 }
 0x10d   :  { %v3617_v31 = vpop.f32.mrf.mxu0  ;;  %v3619_v32 = vpop.f32.mrf.mxu1 }
 0x10e   :  { %4075 = vst [vmem:[#allocation10_spill] sm:$0xff] %v3617_v31  ;;  %4076 = vst [vmem:[#allocation11_spill] sm:$0xff] %v3619_v32 }
 0x10f   :  { %v3621_v33 = vpop.f32.mrf.mxu0  ;;  %v3623_v34 = vpop.f32.mrf.mxu1 }
 0x110   :  { %4077 = vst [vmem:[#allocation12_spill] sm:$0xff] %v3623_v34 }
 0x111   :  { %v3625_v35 = vpop.f32.mrf.mxu0  ;;  %v3627_v36 = vpop.f32.mrf.mxu1 }
 0x112   :  { %4078 = vst [vmem:[#allocation13_spill] sm:$0xff] %v3625_v35  ;;  %4079 = vst [vmem:[#allocation14_spill] sm:$0xff] %v3627_v36 }
 0x113   :  { %v3629_v37 = vpop.f32.mrf.mxu0  ;;  %v3631_v38 = vpop.f32.mrf.mxu1 }
 0x114   :  { %4080 = vst [vmem:[#allocation15_spill] sm:$0xff] %v3629_v37  ;;  %4081 = vst [vmem:[#allocation16_spill] sm:$0xff] %v3631_v38 }
 0x115   :  { %v3633_v39 = vpop.f32.mrf.mxu0  ;;  %v3635_v40 = vpop.f32.mrf.mxu1 }
 0x116   :  { %4082 = vst [vmem:[#allocation17_spill] sm:$0xff] %v3633_v39  ;;  %4083 = vst [vmem:[#allocation18_spill] sm:$0xff] %v3635_v40 }
 0x117   :  { %v3637_v41 = vpop.f32.mrf.mxu0  ;;  %v3639_v42 = vpop.f32.mrf.mxu1 }
 0x118   :  { %4084 = vst [vmem:[#allocation19_spill] sm:$0xff] %v3637_v41  ;;  %4085 = vst [vmem:[#allocation20_spill] sm:$0xff] %v3639_v42 }
 0x119   :  { %v3641_v49 = vpop.f32.mrf.mxu0  ;;  %v3643_v45 = vpop.f32.mrf.mxu1 }
 0x11a   :  { %4086 = vst [vmem:[#allocation21_spill] sm:$0xff] %v3641_v49  ;;  %4087 = vst [vmem:[#allocation22_spill] sm:$0xff] %v3643_v45 }
 0x11b   :  { %v3645_v28 = vpop.f32.mrf.mxu0  ;;  %v3647_v35 = vpop.f32.mrf.mxu1 }
 0x11c   :  { %4088 = vst [vmem:[#allocation23_spill] sm:$0xff] %v3645_v28  ;;  %4089 = vst [vmem:[#allocation24_spill] sm:$0xff] %v3647_v35 }
 0x11d   :  { %v3649_v36 = vpop.f32.mrf.mxu0  ;;  %v3651_v37 = vpop.f32.mrf.mxu1 }
 0x11e   :  { %4090 = vst [vmem:[#allocation25_spill] sm:$0xff] %v3649_v36  ;;  %4091 = vst [vmem:[#allocation26_spill] sm:$0xff] %v3651_v37 }
 0x11f   :  { %v3653_v38 = vpop.f32.mrf.mxu0  ;;  %v3655_v39 = vpop.f32.mrf.mxu1 }
 0x120   :  { %4092 = vst [vmem:[#allocation27_spill] sm:$0xff] %v3653_v38  ;;  %4093 = vst [vmem:[#allocation28_spill] sm:$0xff] %v3655_v39 }
 0x121   :  { %v3657_v40 = vpop.f32.mrf.mxu0  ;;  %v3659_v32 = vpop.f32.mrf.mxu1 }
 0x122   :  { %4094 = vst [vmem:[#allocation29_spill] sm:$0xff] %v3657_v40  ;;  %4095 = vst [vmem:[#allocation30_spill] sm:$0xff] %v3659_v32 }
 0x123   :  { %v3661_v42 = vpop.f32.mrf.mxu0  ;;  %v3663_v49 = vpop.f32.mrf.mxu1 }
 0x124   :  { %4096 = vst [vmem:[#allocation31_spill] sm:$0xff] %v3661_v42  ;;  %4097 = vst [vmem:[#allocation32_spill] sm:$0xff] %v3663_v49 }
 0x125   :  { %v3665_v45 = vpop.f32.mrf.mxu0  ;;  %v3667_v28 = vpop.f32.mrf.mxu1 }
 0x126   :  { %4098 = vst [vmem:[#allocation33_spill] sm:$0xff] %v3665_v45  ;;  %4099 = vst [vmem:[#allocation34_spill] sm:$0xff] %v3667_v28 }
 0x127   :  { %v3669_v35 = vpop.f32.mrf.mxu0  ;;  %v3671_v36 = vpop.f32.mrf.mxu1 }
 0x128   :  { %4100 = vst [vmem:[#allocation35_spill] sm:$0xff] %v3669_v35  ;;  %4101 = vst [vmem:[#allocation36_spill] sm:$0xff] %v3671_v36 }
 0x129   :  { %v3673_v37 = vpop.f32.mrf.mxu0  ;;  %v3675_v38 = vpop.f32.mrf.mxu1 }
 0x12a   :  { %4102 = vst [vmem:[#allocation37_spill] sm:$0xff] %v3673_v37  ;;  %4103 = vst [vmem:[#allocation38_spill] sm:$0xff] %v3675_v38 }
 0x12b   :  { %v3677_v39 = vpop.f32.mrf.mxu0  ;;  %v3679_v40 = vpop.f32.mrf.mxu1 }
 0x12c   :  { %4104 = vst [vmem:[#allocation39_spill] sm:$0xff] %v3677_v39  ;;  %4105 = vst [vmem:[#allocation40_spill] sm:$0xff] %v3679_v40 }
 0x12d   :  { %v3681_v32 = vpop.f32.mrf.mxu0  ;;  %v3683_v42 = vpop.f32.mrf.mxu1 }
 0x12e   :  { %4106 = vst [vmem:[#allocation41_spill] sm:$0xff] %v3681_v32  ;;  %4107 = vst [vmem:[#allocation42_spill] sm:$0xff] %v3683_v42 }
 0x12f   :  { %v3685_v49 = vpop.f32.mrf.mxu0  ;;  %v3687_v45 = vpop.f32.mrf.mxu1 }
 0x130   :  { %4108 = vst [vmem:[#allocation43_spill] sm:$0xff] %v3685_v49  ;;  %4109 = vst [vmem:[#allocation44_spill] sm:$0xff] %v3687_v45 }
 0x131   :  { %v3689_v28 = vpop.f32.mrf.mxu0  ;;  %v3691_v35 = vpop.f32.mrf.mxu1 }
 0x132   :  { %4110 = vst [vmem:[#allocation45_spill] sm:$0xff] %v3689_v28  ;;  %4111 = vst [vmem:[#allocation46_spill] sm:$0xff] %v3691_v35 }
 0x133   :  { %v3693_v36 = vpop.f32.mrf.mxu0  ;;  %v3695_v37 = vpop.f32.mrf.mxu1 }
 0x134   :  { %4112 = vst [vmem:[#allocation47_spill] sm:$0xff] %v3693_v36  ;;  %4113 = vst [vmem:[#allocation48_spill] sm:$0xff] %v3695_v37 }
 0x135   :  { %v3697_v38 = vpop.f32.mrf.mxu0  ;;  %v3699_v39 = vpop.f32.mrf.mxu1 }
 0x136   :  { %4114 = vst [vmem:[#allocation49_spill] sm:$0xff] %v3697_v38  ;;  %4115 = vst [vmem:[#allocation50_spill] sm:$0xff] %v3699_v39 }
 0x137   :  { %v3701_v40 = vpop.f32.mrf.mxu0  ;;  %v3703_v32 = vpop.f32.mrf.mxu1 }
 0x138   :  { %4116 = vst [vmem:[#allocation51_spill] sm:$0xff] %v3701_v40  ;;  %4117 = vst [vmem:[#allocation52_spill] sm:$0xff] %v3703_v32  ;;  %v3718_v32 = vld [vmem:[%s4065_s2] ss:$0 sm:$0xff] }
 0x139   :  { %v3705_v42 = vpop.f32.mrf.mxu0  ;;  %v2925_v49 = vpop.f32.mrf.mxu1 }
 0x13a   :  { %4118 = vst [vmem:[#allocation53_spill] sm:$0xff] %v3705_v42 }
 0x13b   :  { %v3707_v45 = vpop.f32.mrf.mxu0  ;;  %v3709_v28 = vpop.f32.mrf.mxu1 }
 0x13c   :  { %4119 = vst [vmem:[#allocation54_spill] sm:$0xff] %v3707_v45  ;;  %4120 = vst [vmem:[#allocation55_spill] sm:$0xff] %v3709_v28  ;;  %v1911_v45 = vmax.f32 %v3527_v50, %v2925_v49 }
 0x13d   :  { %v2826_v35 = vpop.f32.mrf.mxu0  ;;  %v2926_v31 = vpop.f32.mrf.mxu1 }
 0x13e   :  { %v1861_v38 = vmax.f32 %v3512_v43, %v2826_v35  ;;  %v1912_v24 = vmax.f32 %v3515_v44, %v2926_v31 }
 0x13f   :  { %v3711_v36 = vpop.f32.mrf.mxu0  ;;  %v1671_v37 = vpop.f32.mrf.mxu1 }
 0x140   :  { %4121 = vst [vmem:[#allocation56_spill] sm:$0xff] %v3711_v36  ;;  %v1910_v39 = vmax.f32 %v3519_v46, %v1671_v37 }
 0x141   :  { %v2829_v42 = vpop.f32.mrf.mxu0  ;;  %v2929_v40 = vpop.f32.mrf.mxu1 }
 0x142   :  { %v1959_v41 = vmax.f32 %v1861_v38, %v1910_v39  ;;  %v1864_v36 = vmax.f32 %v3541_v57, %v2829_v42 }
 0x143   :  { %v1284_v28 = vpop.f32.mrf.mxu0  ;;  %v1684_v34 = vpop.f32.mrf.mxu1 }
 0x144   :  { %v2015_v30 = vadd.f32 %v3718_v32, %v1959_v41  ;;  %v1862_v43 = vmax.f32 %v3521_v47, %v1284_v28  ;;  %v1913_v46 = vmax.f32 %v3523_v48, %v1684_v34 }
 0x145   :  { %v2830_v35 = vpop.f32.mrf.mxu0  ;;  %v2930_v37 = vpop.f32.mrf.mxu1 }
 0x146   :  { %v2064_v27 = vmax.f32 %v2015_v30, 0.0  ;;  %v1960_v29 = vmax.f32 %v1862_v43, %v1911_v45  ;;  %v1962_v20 = vmax.f32 %v1864_v36, %v1913_v46  ;;  %v1865_v47 = vmax.f32 %v3529_v51, %v2830_v35 }
 0x147   :  { %v1287_v38 = vpop.f32.mrf.mxu0  ;;  %v1687_v49 = vpop.f32.mrf.mxu1 }
 0x148   :  { %v2615_v50 = vpack.c.bf16 %v2064_v27, %v2064_v27  ;;  %v2016_v39 = vadd.f32 %v3718_v32, %v1960_v29  ;;  %v2018_v41 = vadd.f32 %v3718_v32, %v1962_v20  ;;  %v1863_v57 = vmax.f32 %v3533_v53, %v1287_v38 }
 0x149   :  { %v1914_v48 = vmax.f32 %v3535_v54, %v1687_v49  ;;  %v2833_v28 = vpop.f32.mrf.mxu0  ;;  %v2933_v30 = vpop.f32.mrf.mxu1  ;;  %v1915_v29 = vmax.f32 %v3543_v58, %v2929_v40 }
 0x14a   :  { %2311 = vst.msk [vmem:[%s4066_s3 + $0x8] sm:$0xf] %vm2308_vm3, %v2615_v50  ;;  %v2065_v44 = vmax.f32 %v2016_v39, 0.0  ;;  %v2067_v45 = vmax.f32 %v2018_v41, 0.0  ;;  %v1961_v27 = vmax.f32 %v1863_v57, %v1912_v24  ;;  %v1868_v43 = vmax.f32 %v3557_v1, %v2833_v28 }
 0x14b   :  { %v1963_v31 = vmax.f32 %v1865_v47, %v1914_v48  ;;  %v1300_v20 = vpop.f32.mrf.mxu0  ;;  %v1700_v34 = vpop.f32.mrf.mxu1  ;;  %v1916_v24 = vmax.f32 %v3531_v52, %v2930_v37 }
 0x14c   :  { %v2616_v53 = vpack.c.bf16 %v2065_v44, %v2065_v44  ;;  %v2618_v36 = vpack.c.bf16 %v2067_v45, %v2067_v45  ;;  %v2017_v51 = vadd.f32 %v3718_v32, %v1961_v27  ;;  %v1866_v54 = vmax.f32 %v3537_v55, %v1300_v20 }
 0x14d   :  { %v2019_v42 = vadd.f32 %v3718_v32, %v1963_v31  ;;  %v1917_v46 = vmax.f32 %v3539_v56, %v1700_v34  ;;  %v2834_v35 = vpop.f32.mrf.mxu0  ;;  %v2934_v38 = vpop.f32.mrf.mxu1 }
 0x14e   :  { %2312 = vst.msk [vmem:[%s4066_s3 + $0xc] sm:$0xf] %vm2308_vm3, %v2616_v53  ;;  %2314 = vst.msk [vmem:[%s4066_s3 + $0x14] sm:$0xf] %vm2308_vm3, %v2618_v36  ;;  %v2066_v58 = vmax.f32 %v2017_v51, 0.0  ;;  %v1964_v55 = vmax.f32 %v1866_v54, %v1915_v29  ;;  %v1869_v56 = vmax.f32 %v3545_v59, %v2834_v35 }
 0x14f   :  { %v2068_v40 = vmax.f32 %v2019_v42, 0.0  ;;  %v1966_v1 = vmax.f32 %v1868_v43, %v1917_v46  ;;  %v1303_v49 = vpop.f32.mrf.mxu0  ;;  %v1703_v50 = vpop.f32.mrf.mxu1 }
 0x150   :  { %v2617_v39 = vpack.c.bf16 %v2066_v58, %v2066_v58  ;;  %v2020_v41 = vadd.f32 %v3718_v32, %v1964_v55  ;;  %v1867_v57 = vmax.f32 %v3549_v61, %v1303_v49  ;;  %v1918_v47 = vmax.f32 %v3551_v62, %v1703_v50 }
 0x151   :  { %v2619_v48 = vpack.c.bf16 %v2068_v40, %v2068_v40  ;;  %v2022_v28 = vadd.f32 %v3718_v32, %v1966_v1  ;;  %v2837_v44 = vpop.f32.mrf.mxu0  ;;  %v2937_v45 = vpop.f32.mrf.mxu1  ;;  %v1919_v61 = vmax.f32 %v3559_v2, %v2933_v30 }
 0x152   :  { %2313 = vst.msk [vmem:[%s4066_s3 + $0x10] sm:$0xf] %vm2308_vm3, %v2617_v39  ;;  %v2069_v52 = vmax.f32 %v2020_v41, 0.0  ;;  %v1965_v59 = vmax.f32 %v1867_v57, %v1916_v24  ;;  %v1967_v37 = vmax.f32 %v1869_v56, %v1918_v47  ;;  %v1872_v51 = vmax.f32 %v3573_v9, %v2837_v44 }
 0x153   :  { %2315 = vst.msk [vmem:[%s4066_s3 + $0x18] sm:$0xf] %vm2308_vm3, %v2619_v48  ;;  %v2071_v62 = vmax.f32 %v2022_v28, 0.0  ;;  %v1316_v27 = vpop.f32.mrf.mxu0  ;;  %v1716_v29 = vpop.f32.mrf.mxu1 }
 0x154   :  { %v2620_v31 = vpack.c.bf16 %v2069_v52, %v2069_v52  ;;  %v2021_v20 = vadd.f32 %v3718_v32, %v1965_v59  ;;  %v2023_v34 = vadd.f32 %v3718_v32, %v1967_v37  ;;  %v1870_v53 = vmax.f32 %v3553_v63, %v1316_v27 }
 0x155   :  { %v2622_v36 = vpack.c.bf16 %v2071_v62, %v2071_v62  ;;  %v1921_v54 = vmax.f32 %v3555_v0, %v1716_v29  ;;  %v2838_v42 = vpop.f32.mrf.mxu0  ;;  %v2938_v43 = vpop.f32.mrf.mxu1  ;;  %v1920_v63 = vmax.f32 %v3547_v60, %v2934_v38  ;;  %v1923_v38 = vmax.f32 %v3575_v10, %v2937_v45 }
 0x156   :  { %2316 = vst.msk [vmem:[%s4066_s3 + $0x1c] sm:$0xf] %vm2308_vm3, %v2620_v31  ;;  %v2070_v2 = vmax.f32 %v2021_v20, 0.0  ;;  %v2072_v30 = vmax.f32 %v2023_v34, 0.0  ;;  %v1968_v46 = vmax.f32 %v1870_v53, %v1919_v61  ;;  %v1873_v56 = vmax.f32 %v3561_v3, %v2838_v42 }
 0x157   :  { %2318 = vst.msk [vmem:[%s4066_s3 + $0x24] sm:$0xf] %vm2308_vm3, %v2622_v36  ;;  %v1970_v9 = vmax.f32 %v1872_v51, %v1921_v54  ;;  %v1319_v35 = vpop.f32.mrf.mxu0  ;;  %v1719_v0 = vpop.f32.mrf.mxu1 }
 0x158   :  { %v2621_v58 = vpack.c.bf16 %v2070_v2, %v2070_v2  ;;  %v2623_v55 = vpack.c.bf16 %v2072_v30, %v2072_v30  ;;  %v2024_v24 = vadd.f32 %v3718_v32, %v1968_v46  ;;  %v1871_v40 = vmax.f32 %v3565_v5, %v1319_v35 }
 0x159   :  { %v2026_v1 = vadd.f32 %v3718_v32, %v1970_v9  ;;  %v1922_v49 = vmax.f32 %v3567_v6, %v1719_v0  ;;  %v2841_v50 = vpop.f32.mrf.mxu0  ;;  %v2941_v39 = vpop.f32.mrf.mxu1 }
 0x15a   :  { %2317 = vst.msk [vmem:[%s4066_s3 + $0x20] sm:$0xf] %vm2308_vm3, %v2621_v58  ;;  %2319 = vst.msk [vmem:[%s4066_s3 + $0x28] sm:$0xf] %vm2308_vm3, %v2623_v55  ;;  %v2073_v60 = vmax.f32 %v2024_v24, 0.0  ;;  %v1969_v5 = vmax.f32 %v1871_v40, %v1920_v63  ;;  %v1876_v6 = vmax.f32 %v3589_v17, %v2841_v50 }
 0x15b   :  { %v2075_v41 = vmax.f32 %v2026_v1, 0.0  ;;  %v1971_v3 = vmax.f32 %v1873_v56, %v1922_v49  ;;  %v1332_v57 = vpop.f32.mrf.mxu0  ;;  %v1732_v47 = vpop.f32.mrf.mxu1 }
 0x15c   :  { %v2624_v48 = vpack.c.bf16 %v2073_v60, %v2073_v60  ;;  %v2025_v28 = vadd.f32 %v3718_v32, %v1969_v5  ;;  %v1874_v44 = vmax.f32 %v3569_v7, %v1332_v57  ;;  %v1925_v52 = vmax.f32 %v3571_v8, %v1732_v47 }
 0x15d   :  { %v2626_v59 = vpack.c.bf16 %v2075_v41, %v2075_v41  ;;  %v2027_v37 = vadd.f32 %v3718_v32, %v1971_v3  ;;  %v2842_v61 = vpop.f32.mrf.mxu0  ;;  %v2942_v62 = vpop.f32.mrf.mxu1  ;;  %v1924_v7 = vmax.f32 %v3563_v4, %v2938_v43 }
 0x15e   :  { %2320 = vst.msk [vmem:[%s4066_s3 + $0x2c] sm:$0xf] %vm2308_vm3, %v2624_v48  ;;  %v2074_v10 = vmax.f32 %v2025_v28, 0.0  ;;  %v1972_v17 = vmax.f32 %v1874_v44, %v1923_v38  ;;  %v1974_v45 = vmax.f32 %v1876_v6, %v1925_v52  ;;  %v1877_v51 = vmax.f32 %v3577_v11, %v2842_v61 }
 0x15f   :  { %2322 = vst.msk [vmem:[%s4066_s3 + $0x34] sm:$0xf] %vm2308_vm3, %v2626_v59  ;;  %v2076_v8 = vmax.f32 %v2027_v37, 0.0  ;;  %v1335_v27 = vpop.f32.mrf.mxu0  ;;  %v1735_v29 = vpop.f32.mrf.mxu1  ;;  %v1928_v56 = vmax.f32 %v3579_v12, %v2942_v62 }
 0x160   :  { %v2625_v31 = vpack.c.bf16 %v2074_v10, %v2074_v10  ;;  %v2028_v20 = vadd.f32 %v3718_v32, %v1972_v17  ;;  %v2030_v34 = vadd.f32 %v3718_v32, %v1974_v45  ;;  %v1875_v53 = vmax.f32 %v3581_v13, %v1335_v27  ;;  %v4122_v17 = vld [vmem:[#allocation5_spill] sm:$0xff] }
 0x161   :  { %v2627_v36 = vpack.c.bf16 %v2076_v8, %v2076_v8  ;;  %v1926_v54 = vmax.f32 %v3583_v14, %v1735_v29  ;;  %v2845_v42 = vpop.f32.mrf.mxu0  ;;  %v2945_v2 = vpop.f32.mrf.mxu1  ;;  %v1927_v13 = vmax.f32 %v3591_v18, %v2941_v39 }
 0x162   :  { %2321 = vst.msk [vmem:[%s4066_s3 + $0x30] sm:$0xf] %vm2308_vm3, %v2625_v31  ;;  %v2077_v4 = vmax.f32 %v2028_v20, 0.0  ;;  %v2079_v43 = vmax.f32 %v2030_v34, 0.0  ;;  %v1973_v30 = vmax.f32 %v1875_v53, %v1924_v7  ;;  %v1880_v55 = vmax.f32 %v3605_v25, %v2845_v42 }
 0x163   :  { %2323 = vst.msk [vmem:[%s4066_s3 + $0x38] sm:$0xf] %vm2308_vm3, %v2627_v36  ;;  %v1975_v11 = vmax.f32 %v1877_v51, %v1926_v54  ;;  %v1348_v46 = vpop.f32.mrf.mxu0  ;;  %v1748_v14 = vpop.f32.mrf.mxu1  ;;  %v4124_v54 = vld [vmem:[#allocation8_spill] sm:$0xff] }
 0x164   :  { %v2628_v63 = vpack.c.bf16 %v2077_v4, %v2077_v4  ;;  %v2630_v9 = vpack.c.bf16 %v2079_v43, %v2079_v43  ;;  %v2029_v35 = vadd.f32 %v3718_v32, %v1973_v30  ;;  %v1878_v0 = vmax.f32 %v3585_v15, %v1348_v46  ;;  %v4125_v4 = vld [vmem:[#allocation6_spill] sm:$0xff]  ;;  %v4126_v30 = vld [vmem:[#allocation9_spill] sm:$0xff] }
 0x165   :  { %v2031_v58 = vadd.f32 %v3718_v32, %v1975_v11  ;;  %v1929_v24 = vmax.f32 %v3587_v16, %v1748_v14  ;;  %v2846_v40 = vpop.f32.mrf.mxu0  ;;  %v2946_v1 = vpop.f32.mrf.mxu1 }
 0x166   :  { %2324 = vst.msk [vmem:[%s4066_s3 + $0x3c] sm:$0xf] %vm2308_vm3, %v2628_v63  ;;  %2326 = vst.msk [vmem:[%s4066_s3 + $0x44] sm:$0xf] %vm2308_vm3, %v2630_v9  ;;  %v2078_v18 = vmax.f32 %v2029_v35, 0.0  ;;  %v1976_v15 = vmax.f32 %v1878_v0, %v1927_v13  ;;  %v1881_v16 = vmax.f32 %v3593_v19, %v2846_v40  ;;  %v4127_v9 = vld [vmem:[#allocation12_spill] sm:$0xff] }
 0x167   :  { %v2080_v49 = vmax.f32 %v2031_v58, 0.0  ;;  %v1978_v25 = vmax.f32 %v1880_v55, %v1929_v24  ;;  %v1351_v50 = vpop.f32.mrf.mxu0  ;;  %v1751_v39 = vpop.f32.mrf.mxu1  ;;  %v4128_v55 = vld [vmem:[#allocation19_spill] sm:$0xff] }
 0x168   :  { %v2629_v60 = vpack.c.bf16 %v2078_v18, %v2078_v18  ;;  %v2032_v5 = vadd.f32 %v3718_v32, %v1976_v15  ;;  %v1879_v38 = vmax.f32 %v3597_v21, %v1351_v50  ;;  %v1930_v41 = vmax.f32 %v3599_v22, %v1751_v39 }
 0x169   :  { %v2631_v3 = vpack.c.bf16 %v2080_v49, %v2080_v49  ;;  %v2034_v6 = vadd.f32 %v3718_v32, %v1978_v25  ;;  %v2849_v57 = vpop.f32.mrf.mxu0  ;;  %v2949_v47 = vpop.f32.mrf.mxu1  ;;  %v1931_v21 = vmax.f32 %v3607_v26, %v2945_v2  ;;  %v4130_v25 = vld [vmem:[#allocation11_spill] sm:$0xff] }
 0x16a   :  { %2325 = vst.msk [vmem:[%s4066_s3 + $0x40] sm:$0xf] %vm2308_vm3, %v2629_v60  ;;  %v2081_v12 = vmax.f32 %v2032_v5, 0.0  ;;  %v1977_v19 = vmax.f32 %v1879_v38, %v1928_v56  ;;  %v1979_v48 = vmax.f32 %v1881_v16, %v1930_v41  ;;  %v1884_v10 = vmax.f32 %v3621_v33, %v2849_v57  ;;  %v4129_v56 = vld [vmem:[#allocation10_spill] sm:$0xff] }
 0x16b   :  { %2327 = vst.msk [vmem:[%s4066_s3 + $0x48] sm:$0xf] %vm2308_vm3, %v2631_v3  ;;  %v2083_v22 = vmax.f32 %v2034_v6, 0.0  ;;  %v1364_v28 = vpop.f32.mrf.mxu0  ;;  %v1764_v44 = vpop.f32.mrf.mxu1  ;;  %v1935_v35 = vmax.f32 %v4127_v9, %v2949_v47  ;;  %v4131_v6 = vld [vmem:[#allocation7_spill] sm:$0xff] }
 0x16c   :  { %v2632_v52 = vpack.c.bf16 %v2081_v12, %v2081_v12  ;;  %v2033_v59 = vadd.f32 %v3718_v32, %v1977_v19  ;;  %v2035_v37 = vadd.f32 %v3718_v32, %v1979_v48  ;;  %v1882_v61 = vmax.f32 %v3601_v23, %v1364_v28  ;;  %v4123_v23 = vld [vmem:[#allocation4_spill] sm:$0xff]  ;;  %v4132_v28 = vld [vmem:[#allocation15_spill] sm:$0xff] }
 0x16d   :  { %v2634_v62 = vpack.c.bf16 %v2083_v22, %v2083_v22  ;;  %v1933_v45 = vmax.f32 %v4122_v17, %v1764_v44  ;;  %v2850_v7 = vpop.f32.mrf.mxu0  ;;  %v2950_v8 = vpop.f32.mrf.mxu1  ;;  %v1932_v31 = vmax.f32 %v4123_v23, %v2946_v1 }
 0x16e   :  { %2328 = vst.msk [vmem:[%s4066_s3 + $0x4c] sm:$0xf] %vm2308_vm3, %v2632_v52  ;;  %v2082_v26 = vmax.f32 %v2033_v59, 0.0  ;;  %v2084_v27 = vmax.f32 %v2035_v37, 0.0  ;;  %v1980_v29 = vmax.f32 %v1882_v61, %v1931_v21  ;;  %v1885_v43 = vmax.f32 %v4125_v4, %v2850_v7  ;;  %v4133_v59 = vld [vmem:[#allocation13_spill] sm:$0xff]  ;;  %v4134_v61 = vld [vmem:[#allocation16_spill] sm:$0xff] }
 0x16f   :  { %2330 = vst.msk [vmem:[%s4066_s3 + $0x54] sm:$0xf] %vm2308_vm3, %v2634_v62  ;;  %v1982_v33 = vmax.f32 %v1884_v10, %v1933_v45  ;;  %v1367_v20 = vpop.f32.mrf.mxu0  ;;  %v1767_v34 = vpop.f32.mrf.mxu1  ;;  %v1936_v57 = vmax.f32 %v4131_v6, %v2950_v8 }
 0x170   :  { %v2633_v53 = vpack.c.bf16 %v2082_v26, %v2082_v26  ;;  %v2635_v36 = vpack.c.bf16 %v2084_v27, %v2084_v27  ;;  %v2036_v51 = vadd.f32 %v3718_v32, %v1980_v29  ;;  %v1883_v42 = vmax.f32 %v4124_v54, %v1367_v20  ;;  %v4135_v26 = vld [vmem:[#allocation20_spill] sm:$0xff]  ;;  %v4137_v54 = vld [vmem:[#allocation27_spill] sm:$0xff] }
 0x171   :  { %v2038_v2 = vadd.f32 %v3718_v32, %v1982_v33  ;;  %v1934_v13 = vmax.f32 %v4126_v30, %v1767_v34  ;;  %v2853_v11 = vpop.f32.mrf.mxu0  ;;  %v2953_v46 = vpop.f32.mrf.mxu1 }
 0x172   :  { %2329 = vst.msk [vmem:[%s4066_s3 + $0x50] sm:$0xf] %vm2308_vm3, %v2633_v53  ;;  %2331 = vst.msk [vmem:[%s4066_s3 + $0x58] sm:$0xf] %vm2308_vm3, %v2635_v36  ;;  %v2085_v14 = vmax.f32 %v2036_v51, 0.0  ;;  %v1981_v63 = vmax.f32 %v1883_v42, %v1932_v31  ;;  %v1888_v24 = vmax.f32 %v4128_v55, %v2853_v11  ;;  %v1939_v27 = vmax.f32 %v4135_v26, %v2953_v46  ;;  %v4136_v53 = vld [vmem:[#allocation17_spill] sm:$0xff] }
 0x173   :  { %v2087_v0 = vmax.f32 %v2038_v2, 0.0  ;;  %v1983_v58 = vmax.f32 %v1885_v43, %v1934_v13  ;;  %v1380_v40 = vpop.f32.mrf.mxu0  ;;  %v1780_v1 = vpop.f32.mrf.mxu1  ;;  %v4138_v2 = vld [vmem:[#allocation18_spill] sm:$0xff] }
 0x174   :  { %v2636_v18 = vpack.c.bf16 %v2085_v14, %v2085_v14  ;;  %v2037_v15 = vadd.f32 %v3718_v32, %v1981_v63  ;;  %v1886_v49 = vmax.f32 %v4129_v56, %v1380_v40  ;;  %v1937_v16 = vmax.f32 %v4130_v25, %v1780_v1  ;;  %v4139_v46 = vld [vmem:[#allocation14_spill] sm:$0xff]  ;;  %v4141_v1 = vld [vmem:[#allocation23_spill] sm:$0xff] }
 0x175   :  { %v2638_v50 = vpack.c.bf16 %v2087_v0, %v2087_v0  ;;  %v2039_v39 = vadd.f32 %v3718_v32, %v1983_v58  ;;  %v2854_v60 = vpop.f32.mrf.mxu0  ;;  %v2954_v5 = vpop.f32.mrf.mxu1 }
 0x176   :  { %2332 = vst.msk [vmem:[%s4066_s3 + $0x5c] sm:$0xf] %vm2308_vm3, %v2636_v18  ;;  %v2086_v38 = vmax.f32 %v2037_v15, 0.0  ;;  %v1984_v41 = vmax.f32 %v1886_v49, %v1935_v35  ;;  %v1986_v3 = vmax.f32 %v1888_v24, %v1937_v16  ;;  %v1889_v37 = vmax.f32 %v4133_v59, %v2854_v60  ;;  %v4140_v35 = vld [vmem:[#allocation21_spill] sm:$0xff]  ;;  %v4142_v15 = vld [vmem:[#allocation24_spill] sm:$0xff] }
 0x177   :  { %2334 = vst.msk [vmem:[%s4066_s3 + $0x64] sm:$0xf] %vm2308_vm3, %v2638_v50  ;;  %v2088_v47 = vmax.f32 %v2039_v39, 0.0  ;;  %v1383_v12 = vpop.f32.mrf.mxu0  ;;  %v1783_v19 = vpop.f32.mrf.mxu1  ;;  %v1940_v14 = vmax.f32 %v4139_v46, %v2954_v5 }
 0x178   :  { %v2637_v48 = vpack.c.bf16 %v2086_v38, %v2086_v38  ;;  %v2040_v21 = vadd.f32 %v3718_v32, %v1984_v41  ;;  %v2042_v22 = vadd.f32 %v3718_v32, %v1986_v3  ;;  %v1887_v44 = vmax.f32 %v4132_v28, %v1383_v12  ;;  %v4143_v38 = vld [vmem:[#allocation28_spill] sm:$0xff]  ;;  %v4145_v28 = vld [vmem:[#allocation35_spill] sm:$0xff] }
 0x179   :  { %v2639_v52 = vpack.c.bf16 %v2088_v47, %v2088_v47  ;;  %v1938_v62 = vmax.f32 %v4134_v61, %v1783_v19  ;;  %v2857_v10 = vpop.f32.mrf.mxu0  ;;  %v2957_v17 = vpop.f32.mrf.mxu1 }
 0x17a   :  { %2333 = vst.msk [vmem:[%s4066_s3 + $0x60] sm:$0xf] %vm2308_vm3, %v2637_v48  ;;  %v2089_v45 = vmax.f32 %v2040_v21, 0.0  ;;  %v2091_v7 = vmax.f32 %v2042_v22, 0.0  ;;  %v1985_v8 = vmax.f32 %v1887_v44, %v1936_v57  ;;  %v1892_v42 = vmax.f32 %v4137_v54, %v2857_v10  ;;  %v4144_v48 = vld [vmem:[#allocation25_spill] sm:$0xff] }
 0x17b   :  { %2335 = vst.msk [vmem:[%s4066_s3 + $0x68] sm:$0xf] %vm2308_vm3, %v2639_v52  ;;  %v1987_v29 = vmax.f32 %v1889_v37, %v1938_v62  ;;  %v1396_v23 = vpop.f32.mrf.mxu0  ;;  %v1796_v31 = vpop.f32.mrf.mxu1  ;;  %v1943_v41 = vmax.f32 %v4143_v38, %v2957_v17  ;;  %v4146_v52 = vld [vmem:[#allocation26_spill] sm:$0xff] }
 0x17c   :  { %v2640_v33 = vpack.c.bf16 %v2089_v45, %v2089_v45  ;;  %v2642_v20 = vpack.c.bf16 %v2091_v7, %v2091_v7  ;;  %v2041_v34 = vadd.f32 %v3718_v32, %v1985_v8  ;;  %v1890_v36 = vmax.f32 %v4136_v53, %v1396_v23  ;;  %v4147_v45 = vld [vmem:[#allocation22_spill] sm:$0xff]  ;;  %v4149_v53 = vld [vmem:[#allocation29_spill] sm:$0xff] }
 0x17d   :  { %v2043_v51 = vadd.f32 %v3718_v32, %v1987_v29  ;;  %v1941_v4 = vmax.f32 %v4138_v2, %v1796_v31  ;;  %v2858_v43 = vpop.f32.mrf.mxu0  ;;  %v2958_v30 = vpop.f32.mrf.mxu1 }
 0x17e   :  { %2336 = vst.msk [vmem:[%s4066_s3 + $0x6c] sm:$0xf] %vm2308_vm3, %v2640_v33  ;;  %2338 = vst.msk [vmem:[%s4066_s3 + $0x74] sm:$0xf] %vm2308_vm3, %v2642_v20  ;;  %v2090_v13 = vmax.f32 %v2041_v34, 0.0  ;;  %v1988_v11 = vmax.f32 %v1890_v36, %v1939_v27  ;;  %v1893_v0 = vmax.f32 %v4140_v35, %v2858_v43  ;;  %v1944_v7 = vmax.f32 %v4147_v45, %v2958_v30  ;;  %v4148_v33 = vld [vmem:[#allocation31_spill] sm:$0xff] }
 0x17f   :  { %v2092_v63 = vmax.f32 %v2043_v51, 0.0  ;;  %v1990_v9 = vmax.f32 %v1892_v42, %v1941_v4  ;;  %v1399_v58 = vpop.f32.mrf.mxu0  ;;  %v1799_v55 = vpop.f32.mrf.mxu1  ;;  %v4150_v51 = vld [vmem:[#allocation32_spill] sm:$0xff] }
 0x180   :  { %v2641_v24 = vpack.c.bf16 %v2090_v13, %v2090_v13  ;;  %v2044_v40 = vadd.f32 %v3718_v32, %v1988_v11  ;;  %v1891_v18 = vmax.f32 %v4141_v1, %v1399_v58  ;;  %v1942_v56 = vmax.f32 %v4142_v15, %v1799_v55  ;;  %v4151_v30 = vld [vmem:[#allocation36_spill] sm:$0xff]  ;;  %v4153_v55 = vld [vmem:[#allocation33_spill] sm:$0xff] }
 0x181   :  { %v2643_v49 = vpack.c.bf16 %v2092_v63, %v2092_v63  ;;  %v2046_v25 = vadd.f32 %v3718_v32, %v1990_v9  ;;  %v2861_v16 = vpop.f32.mrf.mxu0  ;;  %v2961_v50 = vpop.f32.mrf.mxu1 }
 0x182   :  { %2337 = vst.msk [vmem:[%s4066_s3 + $0x70] sm:$0xf] %vm2308_vm3, %v2641_v24  ;;  %v2093_v39 = vmax.f32 %v2044_v40, 0.0  ;;  %v1989_v60 = vmax.f32 %v1891_v18, %v1940_v14  ;;  %v1991_v5 = vmax.f32 %v1893_v0, %v1942_v56  ;;  %v1896_v44 = vmax.f32 %v4145_v28, %v2861_v16  ;;  %v4152_v14 = vld [vmem:[#allocation43_spill] sm:$0xff]  ;;  %v4154_v40 = vld [vmem:[#allocation34_spill] sm:$0xff] }
 0x183   :  { %2339 = vst.msk [vmem:[%s4066_s3 + $0x78] sm:$0xf] %vm2308_vm3, %v2643_v49  ;;  %v2095_v3 = vmax.f32 %v2046_v25, 0.0  ;;  %v1412_v6 = vpop.f32.mrf.mxu0  ;;  %v1812_v57 = vpop.f32.mrf.mxu1  ;;  %v1947_v13 = vmax.f32 %v4151_v30, %v2961_v50 }
 0x184   :  { %v2644_v47 = vpack.c.bf16 %v2093_v39, %v2093_v39  ;;  %v2045_v12 = vadd.f32 %v3718_v32, %v1989_v60  ;;  %v2047_v19 = vadd.f32 %v3718_v32, %v1991_v5  ;;  %v1894_v21 = vmax.f32 %v4144_v48, %v1412_v6  ;;  %v4155_v39 = vld [vmem:[#allocation30_spill] sm:$0xff]  ;;  %v4157_v48 = vld [vmem:[#allocation37_spill] sm:$0xff] }
 0x185   :  { %v2646_v22 = vpack.c.bf16 %v2095_v3, %v2095_v3  ;;  %v1945_v59 = vmax.f32 %v4146_v52, %v1812_v57  ;;  %v2862_v37 = vpop.f32.mrf.mxu0  ;;  %v2962_v61 = vpop.f32.mrf.mxu1 }
 0x186   :  { %2340 = vst.msk [vmem:[%s4066_s3 + $0x7c] sm:$0xf] %vm2308_vm3, %v2644_v47  ;;  %v2094_v62 = vmax.f32 %v2045_v12, 0.0  ;;  %v2096_v10 = vmax.f32 %v2047_v19, 0.0  ;;  %v1992_v17 = vmax.f32 %v1894_v21, %v1943_v41  ;;  %v1897_v36 = vmax.f32 %v4149_v53, %v2862_v37  ;;  %v4156_v47 = vld [vmem:[#allocation39_spill] sm:$0xff] }
 0x187   :  { %2342 = vst.msk [vmem:[%s4066_s3 + $0x84] sm:$0xf] %vm2308_vm3, %v2646_v22  ;;  %v1994_v8 = vmax.f32 %v1896_v44, %v1945_v59  ;;  %v1415_v26 = vpop.f32.mrf.mxu0  ;;  %v1815_v27 = vpop.f32.mrf.mxu1  ;;  %v1948_v60 = vmax.f32 %v4155_v39, %v2962_v61  ;;  %v4158_v22 = vld [vmem:[#allocation40_spill] sm:$0xff] }
 0x188   :  { %v2645_v29 = vpack.c.bf16 %v2094_v62, %v2094_v62  ;;  %v2647_v23 = vpack.c.bf16 %v2096_v10, %v2096_v10  ;;  %v2048_v31 = vadd.f32 %v3718_v32, %v1992_v17  ;;  %v1895_v20 = vmax.f32 %v4148_v33, %v1415_v26  ;;  %v4159_v62 = vld [vmem:[#allocation44_spill] sm:$0xff]  ;;  %v4161_v33 = vld [vmem:[#allocation51_spill] sm:$0xff] }
 0x189   :  { %v2050_v34 = vadd.f32 %v3718_v32, %v1994_v8  ;;  %v1946_v54 = vmax.f32 %v4150_v51, %v1815_v27  ;;  %v2865_v42 = vpop.f32.mrf.mxu0  ;;  %v2965_v2 = vpop.f32.mrf.mxu1 }
 0x18a   :  { %2341 = vst.msk [vmem:[%s4066_s3 + $0x80] sm:$0xf] %vm2308_vm3, %v2645_v29  ;;  %2343 = vst.msk [vmem:[%s4066_s3 + $0x88] sm:$0xf] %vm2308_vm3, %v2647_v23  ;;  %v2097_v4 = vmax.f32 %v2048_v31, 0.0  ;;  %v1993_v43 = vmax.f32 %v1895_v20, %v1944_v7  ;;  %v1900_v63 = vmax.f32 %v4152_v14, %v2865_v42  ;;  %v1951_v10 = vmax.f32 %v4159_v62, %v2965_v2  ;;  %v4160_v29 = vld [vmem:[#allocation41_spill] sm:$0xff] }
 0x18b   :  { %v2099_v11 = vmax.f32 %v2050_v34, 0.0  ;;  %v1995_v46 = vmax.f32 %v1897_v36, %v1946_v54  ;;  %v1428_v9 = vpop.f32.mrf.mxu0  ;;  %v1828_v35 = vpop.f32.mrf.mxu1  ;;  %v4162_v34 = vld [vmem:[#allocation42_spill] sm:$0xff]  ;;  %v4174_v62 = vld [vmem:[#allocation55_spill] sm:$0xff] }
 0x18c   :  { %v2648_v0 = vpack.c.bf16 %v2097_v4, %v2097_v4  ;;  %v2049_v58 = vadd.f32 %v3718_v32, %v1993_v43  ;;  %v1898_v24 = vmax.f32 %v4153_v55, %v1428_v9  ;;  %v1949_v1 = vmax.f32 %v4154_v40, %v1828_v35  ;;  %v4163_v2 = vld [vmem:[#allocation38_spill] sm:$0xff]  ;;  %v4165_v35 = vld [vmem:[#allocation47_spill] sm:$0xff] }
 0x18d   :  { %v2650_v18 = vpack.c.bf16 %v2099_v11, %v2099_v11  ;;  %v2051_v15 = vadd.f32 %v3718_v32, %v1995_v46  ;;  %v2866_v56 = vpop.f32.mrf.mxu0  ;;  %v2966_v49 = vpop.f32.mrf.mxu1  ;;  %v4168_v40 = vld [vmem:[#allocation2_spill] sm:$0xff] }
 0x18e   :  { %2344 = vst.msk [vmem:[%s4066_s3 + $0x8c] sm:$0xf] %vm2308_vm3, %v2648_v0  ;;  %v2098_v25 = vmax.f32 %v2049_v58, 0.0  ;;  %v1996_v16 = vmax.f32 %v1898_v24, %v1947_v13  ;;  %v1998_v50 = vmax.f32 %v1900_v63, %v1949_v1  ;;  %v1901_v21 = vmax.f32 %v4157_v48, %v2866_v56  ;;  %v4164_v13 = vld [vmem:[#allocation45_spill] sm:$0xff]  ;;  %v4166_v58 = vld [vmem:[#allocation48_spill] sm:$0xff] }
 0x18f   :  { %2346 = vst.msk [vmem:[%s4066_s3 + $0x94] sm:$0xf] %vm2308_vm3, %v2650_v18  ;;  %v2100_v5 = vmax.f32 %v2051_v15, 0.0  ;;  %v1431_v38 = vpop.f32.mrf.mxu0  ;;  %v1831_v41 = vpop.f32.mrf.mxu1  ;;  %v1952_v4 = vmax.f32 %v4163_v2, %v2966_v49  ;;  %v4167_v24 = vld [vmem:[#allocation56_spill] sm:$0xff] }
 0x190   :  { %v2649_v3 = vpack.c.bf16 %v2098_v25, %v2098_v25  ;;  %v2052_v6 = vadd.f32 %v3718_v32, %v1996_v16  ;;  %v2054_v57 = vadd.f32 %v3718_v32, %v1998_v50  ;;  %v1899_v12 = vmax.f32 %v4156_v47, %v1431_v38  ;;  %v4169_v50 = vld [vmem:[#allocation50_spill] sm:$0xff]  ;;  %v4171_v47 = vld [vmem:[#allocation3_spill] sm:$0xff] }
 0x191   :  { %v2651_v19 = vpack.c.bf16 %v2100_v5, %v2100_v5  ;;  %v1950_v28 = vmax.f32 %v4158_v22, %v1831_v41  ;;  %v2869_v44 = vpop.f32.mrf.mxu0  ;;  %v2969_v52 = vpop.f32.mrf.mxu1  ;;  %v1859_v1 = vmax.f32 %v4168_v40, %v4167_v24  ;;  %v4173_v22 = vld [vmem:[#allocation49_spill] sm:$0xff] }
 0x192   :  { %2345 = vst.msk [vmem:[%s4066_s3 + $0x90] sm:$0xf] %vm2308_vm3, %v2649_v3  ;;  %v2101_v59 = vmax.f32 %v2052_v6, 0.0  ;;  %v2103_v37 = vmax.f32 %v2054_v57, 0.0  ;;  %v1997_v61 = vmax.f32 %v1899_v12, %v1948_v60  ;;  %v1904_v20 = vmax.f32 %v4161_v33, %v2869_v44  ;;  %v4170_v57 = vld [vmem:[#allocation53_spill] sm:$0xff] }
 0x193   :  { %2347 = vst.msk [vmem:[%s4066_s3 + $0x98] sm:$0xf] %vm2308_vm3, %v2651_v19  ;;  %v1999_v17 = vmax.f32 %v1901_v21, %v1950_v28  ;;  %v1444_v45 = vpop.f32.mrf.mxu0  ;;  %v1844_v7 = vpop.f32.mrf.mxu1  ;;  %v1860_v12 = vmax.f32 %v4171_v47, %v4170_v57  ;;  %v4172_v19 = vld [vmem:[#allocation52_spill] sm:$0xff] }
 0x194   :  { %v2652_v8 = vpack.c.bf16 %v2101_v59, %v2101_v59  ;;  %v2654_v26 = vpack.c.bf16 %v2103_v37, %v2103_v37  ;;  %v2053_v27 = vadd.f32 %v3718_v32, %v1997_v61  ;;  %v1902_v23 = vmax.f32 %v4160_v29, %v1444_v45 }
 0x195   :  { %v2055_v31 = vadd.f32 %v3718_v32, %v1999_v17  ;;  %v1953_v53 = vmax.f32 %v4162_v34, %v1844_v7  ;;  %v2870_v36 = vpop.f32.mrf.mxu0  ;;  %v2970_v51 = vpop.f32.mrf.mxu1  ;;  %v1955_v48 = vmax.f32 %v4172_v19, %v2969_v52 }
 0x196   :  { %2348 = vst.msk [vmem:[%s4066_s3 + $0x9c] sm:$0xf] %vm2308_vm3, %v2652_v8  ;;  %2350 = vst.msk [vmem:[%s4066_s3 + $0xa4] sm:$0xf] %vm2308_vm3, %v2654_v26  ;;  %v2102_v54 = vmax.f32 %v2053_v27, 0.0  ;;  %v2000_v42 = vmax.f32 %v1902_v23, %v1951_v10  ;;  %v1905_v11 = vmax.f32 %v4164_v13, %v2870_v36  ;;  %v4175_v27 = vld [vmem:[#allocation46_spill] sm:$0xff] }
 0x197   :  { %v2104_v43 = vmax.f32 %v2055_v31, 0.0  ;;  %v2002_v30 = vmax.f32 %v1904_v20, %v1953_v53  ;;  %v1447_v46 = vpop.f32.mrf.mxu0  ;;  %v1847_v14 = vpop.f32.mrf.mxu1  ;;  %v1956_v29 = vmax.f32 %v4175_v27, %v2970_v51  ;;  %v4176_v31 = vld [vmem:[#allocation54_spill] sm:$0xff] }
 0x198   :  { %v2653_v63 = vpack.c.bf16 %v2102_v54, %v2102_v54  ;;  %v2056_v9 = vadd.f32 %v3718_v32, %v2000_v42  ;;  %v1903_v0 = vmax.f32 %v4165_v35, %v1447_v46  ;;  %v1954_v55 = vmax.f32 %v4166_v58, %v1847_v14 }
 0x199   :  { %v2655_v18 = vpack.c.bf16 %v2104_v43, %v2104_v43  ;;  %v2058_v15 = vadd.f32 %v3718_v32, %v2002_v30  ;;  %v2873_v56 = vpop.f32.mrf.mxu0 }
 0x19a   :  { %2349 = vst.msk [vmem:[%s4066_s3 + $0xa0] sm:$0xf] %vm2308_vm3, %v2653_v63  ;;  %v2105_v49 = vmax.f32 %v2056_v9, 0.0  ;;  %v2001_v25 = vmax.f32 %v1903_v0, %v1952_v4  ;;  %v2003_v16 = vmax.f32 %v1905_v11, %v1954_v55  ;;  %v1908_v39 = vmax.f32 %v2873_v56, %v4169_v50 }
 0x19b   :  { %2351 = vst.msk [vmem:[%s4066_s3 + $0xa8] sm:$0xf] %vm2308_vm3, %v2655_v18  ;;  %v2107_v60 = vmax.f32 %v2058_v15, 0.0  ;;  %v1460_v5 = vpop.f32.mrf.mxu0 }
 0x19c   :  { %v2656_v38 = vpack.c.bf16 %v2105_v49, %v2105_v49  ;;  %v2057_v41 = vadd.f32 %v3718_v32, %v2001_v25  ;;  %v2059_v3 = vadd.f32 %v3718_v32, %v2003_v16  ;;  %v1957_v6 = vmax.f32 %v1859_v1, %v1908_v39 }
 0x19d   :  { %v2658_v21 = vpack.c.bf16 %v2107_v60, %v2107_v60  ;;  %v1906_v28 = vmax.f32 %v4173_v22, %v1460_v5  ;;  %v2874_v44 = vpop.f32.mrf.mxu0 }
 0x19e   :  { %2352 = vst.msk [vmem:[%s4066_s3 + $0xac] sm:$0xf] %vm2308_vm3, %v2656_v38  ;;  %v2106_v59 = vmax.f32 %v2057_v41, 0.0  ;;  %v2108_v37 = vmax.f32 %v2059_v3, 0.0  ;;  %v2013_v61 = vadd.f32 %v3718_v32, %v1957_v6  ;;  %v1909_v10 = vmax.f32 %v2874_v44, %v4174_v62 }
 0x19f   :  { %2354 = vst.msk [vmem:[%s4066_s3 + $0xb4] sm:$0xf] %vm2308_vm3, %v2658_v21  ;;  %v2004_v52 = vmax.f32 %v1906_v28, %v1955_v48  ;;  %v1463_v17 = vpop.f32.mrf.mxu0 }
 0x1a0   :  { %v2657_v45 = vpack.c.bf16 %v2106_v59, %v2106_v59  ;;  %v2659_v7 = vpack.c.bf16 %v2108_v37, %v2108_v37  ;;  %v2062_v8 = vmax.f32 %v2013_v61, 0.0  ;;  %v1958_v26 = vmax.f32 %v1860_v12, %v1909_v10 }
 0x1a1   :  { %v2060_v23 = vadd.f32 %v3718_v32, %v2004_v52  ;;  %v1907_v33 = vmax.f32 %v4176_v31, %v1463_v17 }
 0x1a2   :  { %2353 = vst.msk [vmem:[%s4066_s3 + $0xb0] sm:$0xf] %vm2308_vm3, %v2657_v45  ;;  %2355 = vst.msk [vmem:[%s4066_s3 + $0xb8] sm:$0xf] %vm2308_vm3, %v2659_v7  ;;  %v2613_v20 = vpack.c.bf16 %v2062_v8, %v2062_v8  ;;  %v2014_v34 = vadd.f32 %v3718_v32, %v1958_v26 }
 0x1a3   :  { %v2109_v53 = vmax.f32 %v2060_v23, 0.0  ;;  %v2005_v36 = vmax.f32 %v1907_v33, %v1956_v29 }
 0x1a4   :  { %2309 = vst.msk [vmem:[%s4066_s3] sm:$0xf] %vm2308_vm3, %v2613_v20  ;;  %v2063_v51 = vmax.f32 %v2014_v34, 0.0 }
 0x1a5   :  { %v2660_v54 = vpack.c.bf16 %v2109_v53, %v2109_v53  ;;  %v2061_v42 = vadd.f32 %v3718_v32, %v2005_v36 }
 0x1a6   :  { %v2614_v2 = vpack.c.bf16 %v2063_v51, %v2063_v51 }
 0x1a7   :  { %2356 = vst.msk [vmem:[%s4066_s3 + $0xbc] sm:$0xf] %vm2308_vm3, %v2660_v54  ;;  %v2110_v4 = vmax.f32 %v2061_v42, 0.0 }
 0x1a8   :  { %2310 = vst.msk [vmem:[%s4066_s3 + $0x4] sm:$0xf] %vm2308_vm3, %v2614_v2 }
 0x1a9   :  { %v2661_v43 = vpack.c.bf16 %v2110_v4, %v2110_v4 }
 0x1ab   :  { %2357 = vst.msk [vmem:[%s4066_s3 + $0xc0] sm:$0xf] %vm2308_vm3, %v2661_v43 }

// kernel: quantized_cnn_forward.3
= control target key start
LH: loop header
LB: loop body
LE: loop exit
PB: predicated region body
PF: predicated region fallthrough
CT: control target
= control target key end

     0   :  { %v2494_v1 = vmov 0   ;;  %vm525_vm0 = vcmask 130048   ;;  %s3204_s0 = inlined_call_operand.vmem [shape: bf16[1,200,400], index: 0, kind: input, shape index: {}]   ;;  %s3205_s1 = inlined_call_operand.vmem [shape: bf16[400,32], index: 1, kind: input, shape index: {}]   ;;  %s3206_s2 = inlined_call_operand.vmem [shape: f32[1,32], index: 2, kind: input, shape index: {}]   ;;  %s3207_s3 = inlined_call_operand.vmem [shape: bf16[800,120], index: 3, kind: input, shape index: {}]   ;;  %s3208_s4 = inlined_call_operand.vmem [shape: f32[1,120], index: 4, kind: input, shape index: {}]   ;;  %s3209_s5 = inlined_call_operand.vmem [shape: bf16[120,84], index: 5, kind: input, shape index: {}]   ;;  %s3210_s6 = inlined_call_operand.vmem [shape: f32[1,84], index: 6, kind: input, shape index: {}]   ;;  %s3211_s7 = inlined_call_operand.vmem [shape: bf16[84,10], index: 7, kind: input, shape index: {}]   ;;  %s3212_s8 = inlined_call_operand.vmem [shape: f32[1,10], index: 8, kind: input, shape index: {}]   ;;  %s3213_s9 = inlined_call_operand.hbm [shape: f32[2,10], index: 9, kind: output, shape index: {}]  }
   0x1   :  { %v2307_v0 = vld [vmem:[%s3205_s1 + $0x78] sm:$0xff]   ;;  %701 = vmatprep.subr.bf16.mxu1 %v2494_v1  ;;  %v2310_v4 = vld [vmem:[%s3205_s1 + $0x70] sm:$0xff]   ;;  %v2313_v7 = vld [vmem:[%s3205_s1 + $0x68] sm:$0xff]  }
   0x2   :  { %v2308_v2 = vld [vmem:[%s3205_s1 + $0xb8] sm:$0xff]   ;;  %2032 = vmatprep.subr.bf16.mxu0 %v2307_v0  ;;  %v2311_v5 = vld [vmem:[%s3205_s1 + $0xb0] sm:$0xff]   ;;  %v2314_v8 = vld [vmem:[%s3205_s1 + $0xa8] sm:$0xff]  }
   0x3   :  { %v2309_v3 = vld [vmem:[%s3205_s1 + $0x38] sm:$0xff]   ;;  %702 = vmatpush1.bf16.msra.mxu1 %v2308_v2  ;;  %v2312_v6 = vld [vmem:[%s3205_s1 + $0x30] sm:$0xff]   ;;  %v2315_v9 = vld [vmem:[%s3205_s1 + $0x28] sm:$0xff]  }
   0x4   :  { %2033 = vmatpush3.bf16.msra.mxu0 %v2309_v3  ;;  %703 = vmatprep.subr.bf16.mxu1 %v2494_v1  ;;  %v2316_v10 = vld [vmem:[%s3205_s1 + $0x60] sm:$0xff]   ;;  %v2319_v13 = vld [vmem:[%s3205_s1 + $0x58] sm:$0xff]   ;;  %v2322_v16 = vld [vmem:[%s3205_s1 + $0x50] sm:$0xff]  }
   0x5   :  { %2034 = vmatprep.subr.bf16.mxu0 %v2310_v4  ;;  %v2317_v11 = vld [vmem:[%s3205_s1 + $0xa0] sm:$0xff]   ;;  %v2320_v14 = vld [vmem:[%s3205_s1 + $0x98] sm:$0xff]   ;;  %v2323_v17 = vld [vmem:[%s3205_s1 + $0x90] sm:$0xff]  }
   0x6   :  { %v2318_v12 = vld [vmem:[%s3205_s1 + $0x20] sm:$0xff]   ;;  %v2321_v15 = vld [vmem:[%s3205_s1 + $0x18] sm:$0xff]   ;;  %v2324_v18 = vld [vmem:[%s3205_s1 + $0x10] sm:$0xff]  }
   0x7   :  { %704 = vmatpush1.bf16.msra.mxu1 %v2311_v5  ;;  %v2325_v19 = vld [vmem:[%s3205_s1 + $0x48] sm:$0xff]   ;;  %v2328_v22 = vld [vmem:[%s3205_s1 + $0x40] sm:$0xff]  }
   0x8   :  { %2035 = vmatpush3.bf16.msra.mxu0 %v2312_v6  ;;  %705 = vmatprep.subr.bf16.mxu1 %v2494_v1  ;;  %v2326_v20 = vld [vmem:[%s3205_s1 + $0x88] sm:$0xff]   ;;  %v2333_v23 = vld [vmem:[%s3204_s0 + $0x4] ss:$16 sps:$4 sm:$0xff]   ;;  %v2331_v27 = vld [vmem:[%s3204_s0] ss:$16 sps:$4 sm:$0xff]  }
   0x9   :  { %2036 = vmatprep.subr.bf16.mxu0 %v2313_v7  ;;  %v2327_v21 = vld [vmem:[%s3205_s1 + $0x8] sm:$0xff]   ;;  %v2329_v24 = vld [vmem:[%s3205_s1 + $0x80] sm:$0xff]   ;;  %597 = vmatprep.mubr.bf16.mxu0 %v2333_v23 }
   0xa   :  { %v2337_v25 = vld [vmem:[%s3204_s0 + $0xc] ss:$16 sps:$4 sm:$0xff]   ;;  %v2330_v26 = vld [vmem:[%s3205_s1] sm:$0xff]   ;;  %v2335_v30 = vld [vmem:[%s3204_s0 + $0x8] ss:$16 sps:$4 sm:$0xff]  }
   0xb   :  { %706 = vmatpush1.bf16.msra.mxu1 %v2314_v8  ;;  %1948 = vmatprep.mubr.msk.bf16.mxu1 %vm525_vm0, %v2337_v25  ;;  %v2334_v28 = vld [vmem:[%s3205_s1 + $0xc0] sm:$0xff]   ;;  %v2341_v31 = vld [vmem:[%s3204_s0 + $0x2c] ss:$16 sps:$4 sm:$0xff]   ;;  %v2343_v34 = vld [vmem:[%s3204_s0 + $0x28] ss:$16 sps:$4 sm:$0xff]  }
   0xc   :  { %2037 = vmatpush3.bf16.msra.mxu0 %v2315_v9  ;;  %707 = vmatprep.subr.bf16.mxu1 %v2494_v1  ;;  %v2338_v29 = vld [vmem:[%s3204_s0 + $0x24] ss:$16 sps:$4 sm:$0xff]   ;;  %v2340_v32 = vld [vmem:[%s3204_s0 + $0x20] ss:$16 sps:$4 sm:$0xff]   ;;  %v2347_v35 = vld [vmem:[%s3204_s0 + $0x4c] ss:$16 sps:$4 sm:$0xff]  }
   0xd   :  { %2038 = vmatprep.subr.bf16.mxu0 %v2316_v10  ;;  %v2344_v33 = vld [vmem:[%s3204_s0 + $0x44] ss:$16 sps:$4 sm:$0xff]   ;;  %v2346_v36 = vld [vmem:[%s3204_s0 + $0x40] ss:$16 sps:$4 sm:$0xff]   ;;  %v2349_v38 = vld [vmem:[%s3204_s0 + $0x48] ss:$16 sps:$4 sm:$0xff]  }
   0xe   :  { %v2350_v37 = vld [vmem:[%s3204_s0 + $0x64] ss:$16 sps:$4 sm:$0xff]   ;;  %v2353_v39 = vld [vmem:[%s3204_s0 + $0x6c] ss:$16 sps:$4 sm:$0xff]   ;;  %v2352_v40 = vld [vmem:[%s3204_s0 + $0x60] ss:$16 sps:$4 sm:$0xff]  }
   0xf   :  { %708 = vmatpush1.bf16.msra.mxu1 %v2317_v11  ;;  %v2356_v41 = vld [vmem:[%s3204_s0 + $0x84] ss:$16 sps:$4 sm:$0xff]   ;;  %v2355_v42 = vld [vmem:[%s3204_s0 + $0x68] ss:$16 sps:$4 sm:$0xff]   ;;  %v2359_v43 = vld [vmem:[%s3204_s0 + $0x8c] ss:$16 sps:$4 sm:$0xff]  }
  0x10   :  { %2039 = vmatpush3.bf16.msra.mxu0 %v2318_v12  ;;  %709 = vmatprep.subr.bf16.mxu1 %v2494_v1  ;;  %v2358_v44 = vld [vmem:[%s3204_s0 + $0x80] ss:$16 sps:$4 sm:$0xff]   ;;  %v2362_v45 = vld [vmem:[%s3204_s0 + $0xa4] ss:$16 sps:$4 sm:$0xff]   ;;  %v2361_v46 = vld [vmem:[%s3204_s0 + $0x88] ss:$16 sps:$4 sm:$0xff]  }
  0x11   :  { %2040 = vmatprep.subr.bf16.mxu0 %v2319_v13  ;;  %v2365_v47 = vld [vmem:[%s3204_s0 + $0xac] ss:$16 sps:$4 sm:$0xff]   ;;  %v2364_v48 = vld [vmem:[%s3204_s0 + $0xa0] ss:$16 sps:$4 sm:$0xff]   ;;  %v2368_v49 = vld [vmem:[%s3204_s0 + $0xc4] ss:$16 sps:$4 sm:$0xff]  }
  0x12   :  { %v2367_v50 = vld [vmem:[%s3204_s0 + $0xa8] ss:$16 sps:$4 sm:$0xff]   ;;  %v2371_v51 = vld [vmem:[%s3204_s0 + $0xcc] ss:$16 sps:$4 sm:$0xff]   ;;  %v2370_v52 = vld [vmem:[%s3204_s0 + $0xc0] ss:$16 sps:$4 sm:$0xff]  }
  0x13   :  { %710 = vmatpush1.bf16.msra.mxu1 %v2320_v14  ;;  %v2374_v53 = vld [vmem:[%s3204_s0 + $0xe4] ss:$16 sps:$4 sm:$0xff]   ;;  %v2373_v54 = vld [vmem:[%s3204_s0 + $0xc8] ss:$16 sps:$4 sm:$0xff]   ;;  %v2377_v55 = vld [vmem:[%s3204_s0 + $0xec] ss:$16 sps:$4 sm:$0xff]  }
  0x14   :  { %2041 = vmatpush3.bf16.msra.mxu0 %v2321_v15  ;;  %711 = vmatprep.subr.bf16.mxu1 %v2494_v1  ;;  %v2376_v56 = vld [vmem:[%s3204_s0 + $0xe0] ss:$16 sps:$4 sm:$0xff]   ;;  %v2380_v57 = vld [vmem:[%s3204_s0 + $0x104] ss:$16 sps:$4 sm:$0xff]   ;;  %v2379_v58 = vld [vmem:[%s3204_s0 + $0xe8] ss:$16 sps:$4 sm:$0xff]  }
  0x15   :  { %2042 = vmatprep.subr.bf16.mxu0 %v2322_v16  ;;  %v2383_v59 = vld [vmem:[%s3204_s0 + $0x10c] ss:$16 sps:$4 sm:$0xff]   ;;  %v2382_v60 = vld [vmem:[%s3204_s0 + $0x100] ss:$16 sps:$4 sm:$0xff]   ;;  %v2386_v61 = vld [vmem:[%s3204_s0 + $0x124] ss:$16 sps:$4 sm:$0xff]  }
  0x16   :  { %v2385_v62 = vld [vmem:[%s3204_s0 + $0x108] ss:$16 sps:$4 sm:$0xff]   ;;  %v2389_v63 = vld [vmem:[%s3204_s0 + $0x12c] ss:$16 sps:$4 sm:$0xff]  }
  0x17   :  { %712 = vmatpush1.bf16.msra.mxu1 %v2323_v17 }
  0x18   :  { %2043 = vmatpush3.bf16.msra.mxu0 %v2324_v18  ;;  %713 = vmatprep.subr.bf16.mxu1 %v2494_v1 }
  0x19   :  { %2044 = vmatprep.subr.bf16.mxu0 %v2325_v19 }
  0x1b   :  { %714 = vmatpush1.bf16.msra.mxu1 %v2326_v20 }
  0x1c   :  { %2045 = vmatpush3.bf16.msra.mxu0 %v2327_v21  ;;  %715 = vmatprep.subr.bf16.mxu1 %v2494_v1 }
  0x1d   :  { %2046 = vmatprep.subr.bf16.mxu0 %v2328_v22 }
  0x1f   :  { %716 = vmatpush1.bf16.msra.mxu1 %v2329_v24 }
  0x20   :  { %2047 = vmatpush3.bf16.msra.mxu0 %v2330_v26  ;;  %731 = vmatprep.subr.bf16.mxu1 %v2494_v1 }
  0x23   :  { %598 = vmatmul.mubr.bf16.vlgmr.msra.gmra.mxu0 %v2331_v27  ;;  %732 = vmatpush2.bf16.msra.mxu1 %v2334_v28 }
  0x24   :  { %605 = vmatprep.mubr.bf16.mxu0 %v2338_v29 }
  0x26   :  { %734 = vmatmul.mubr.bf16.vlgmr.msra.gmra.mxu1 %v2335_v30 }
  0x27   :  { %1949 = vmatprep.mubr.msk.bf16.mxu1 %vm525_vm0, %v2341_v31 }
  0x2b   :  { %606 = vmatmul.mubr.bf16.gmra.mxu0 %v2340_v32 }
  0x2c   :  { %613 = vmatprep.mubr.bf16.mxu0 %v2344_v33 }
  0x2e   :  { %742 = vmatmul.mubr.bf16.gmra.mxu1 %v2343_v34 }
  0x2f   :  { %1950 = vmatprep.mubr.msk.bf16.mxu1 %vm525_vm0, %v2347_v35 }
  0x33   :  { %614 = vmatmul.mubr.bf16.gmra.mxu0 %v2346_v36 }
  0x34   :  { %621 = vmatprep.mubr.bf16.mxu0 %v2350_v37 }
  0x36   :  { %750 = vmatmul.mubr.bf16.gmra.mxu1 %v2349_v38 }
  0x37   :  { %1951 = vmatprep.mubr.msk.bf16.mxu1 %vm525_vm0, %v2353_v39 }
  0x3b   :  { %622 = vmatmul.mubr.bf16.gmra.mxu0 %v2352_v40 }
  0x3c   :  { %629 = vmatprep.mubr.bf16.mxu0 %v2356_v41 }
  0x3e   :  { %758 = vmatmul.mubr.bf16.gmra.mxu1 %v2355_v42 }
  0x3f   :  { %1952 = vmatprep.mubr.msk.bf16.mxu1 %vm525_vm0, %v2359_v43 }
  0x43   :  { %630 = vmatmul.mubr.bf16.gmra.mxu0 %v2358_v44 }
  0x44   :  { %637 = vmatprep.mubr.bf16.mxu0 %v2362_v45 }
  0x46   :  { %766 = vmatmul.mubr.bf16.gmra.mxu1 %v2361_v46 }
  0x47   :  { %1953 = vmatprep.mubr.msk.bf16.mxu1 %vm525_vm0, %v2365_v47 }
  0x4b   :  { %638 = vmatmul.mubr.bf16.gmra.mxu0 %v2364_v48 }
  0x4c   :  { %645 = vmatprep.mubr.bf16.mxu0 %v2368_v49 }
  0x4e   :  { %774 = vmatmul.mubr.bf16.gmra.mxu1 %v2367_v50 }
  0x4f   :  { %1954 = vmatprep.mubr.msk.bf16.mxu1 %vm525_vm0, %v2371_v51 }
  0x53   :  { %646 = vmatmul.mubr.bf16.gmra.mxu0 %v2370_v52 }
  0x54   :  { %653 = vmatprep.mubr.bf16.mxu0 %v2374_v53 }
  0x56   :  { %782 = vmatmul.mubr.bf16.gmra.mxu1 %v2373_v54 }
  0x57   :  { %1955 = vmatprep.mubr.msk.bf16.mxu1 %vm525_vm0, %v2377_v55 }
  0x5b   :  { %654 = vmatmul.mubr.bf16.gmra.mxu0 %v2376_v56 }
  0x5c   :  { %661 = vmatprep.mubr.bf16.mxu0 %v2380_v57 }
  0x5e   :  { %790 = vmatmul.mubr.bf16.gmra.mxu1 %v2379_v58 }
  0x5f   :  { %1956 = vmatprep.mubr.msk.bf16.mxu1 %vm525_vm0, %v2383_v59 }
  0x63   :  { %662 = vmatmul.mubr.bf16.gmra.mxu0 %v2382_v60 }
  0x64   :  { %14 = vsyncpa [#allocation3], 0  ;;  %669 = vmatprep.mubr.bf16.mxu0 %v2386_v61  ;;  %v2388_v0 = vld [vmem:[%s3204_s0 + $0x120] ss:$16 sps:$4 sm:$0xff]   ;;  %v2392_v1 = vld [vmem:[%s3204_s0 + $0x144] ss:$16 sps:$4 sm:$0xff]  }
  0x65   :  { %v2391_v2 = vld [vmem:[%s3204_s0 + $0x128] ss:$16 sps:$4 sm:$0xff]   ;;  %v2395_v3 = vld [vmem:[%s3204_s0 + $0x14c] ss:$16 sps:$4 sm:$0xff]   ;;  %v2394_v4 = vld [vmem:[%s3204_s0 + $0x140] ss:$16 sps:$4 sm:$0xff]  }
  0x66   :  { %798 = vmatmul.mubr.bf16.gmra.mxu1 %v2385_v62  ;;  %v2398_v5 = vld [vmem:[%s3204_s0 + $0x164] ss:$16 sps:$4 sm:$0xff]   ;;  %v2397_v6 = vld [vmem:[%s3204_s0 + $0x148] ss:$16 sps:$4 sm:$0xff]   ;;  %v2401_v7 = vld [vmem:[%s3204_s0 + $0x16c] ss:$16 sps:$4 sm:$0xff]  }
  0x67   :  { %1957 = vmatprep.mubr.msk.bf16.mxu1 %vm525_vm0, %v2389_v63  ;;  %v82_v8 = vld [vmem:[%s3204_s0 + $0x180] sm:$0xff]  ;;  %v83_v11 = vld [vmem:[%s3204_s0 + $0x188] sm:$0xff]  ;;  %v2408_v16 = vld [vmem:[%s3207_s3 + $0x78] sm:$0xff]   ;;  %vm844_vm1 = vcmask 1045504   ;;  %vm913_vm2 = vcmask 1043456   ;;  %s2495_s23 = smov 96  }
  0x68   :  { %v2400_v9 = vld [vmem:[%s3204_s0 + $0x160] ss:$16 sps:$4 sm:$0xff]   ;;  %v1920_v10 = vcombine.high %v82_v8, %v82_v8  ;;  %v2403_v12 = vld [vmem:[%s3204_s0 + $0x168] ss:$16 sps:$4 sm:$0xff]   ;;  %v1922_v13 = vcombine.high %v83_v11, %v83_v11  ;;  %v1919_v14 = vcombine.low %v82_v8, %v82_v8  ;;  %v1921_v15 = vcombine.low %v83_v11, %v83_v11  ;;  %2126 = vmatprep.subr.bf16.mxu0 %v2408_v16  ;;  %s2496_s24 = smov 32   ;;  %s2497_s29 = smov 64  }
  0x69   :  { %v2409_v17 = vld [vmem:[%s3207_s3 + $0x38] sm:$0xff]   ;;  %v2410_v18 = vld [vmem:[%s3207_s3 + $0x70] sm:$0xff]   ;;  %v2412_v25 = vld [vmem:[%s3207_s3 + $0x68] sm:$0xff]   ;;  %vm1014_vm3 = vcmask 261120   ;;  %vm1016_vm4 = vcmask 523264   ;;  %vm1018_vm5 = vcmask 785408  }
  0x6a   :  { %v2414_v20 = vld [vmem:[%s3207_s3 + $0xf8] sm:$0xff]   ;;  %2127 = vmatpush3.bf16.msra.mxu0 %v2409_v17  ;;  %v2411_v22 = vld [vmem:[%s3207_s3 + $0x30] sm:$0xff]   ;;  %v2422_v30 = vld [vmem:[%s3207_s3 + $0xe8] sm:$0xff]   ;;  %vm2499_vm6 = vmmov 0   ;;  %vm1811_vm7 = vcmask 1041408   ;;  %vm1707_vm8 = vcmask 982016  }
  0x6b   :  { %670 = vmatmul.mubr.bf16.gmra.mxu0 %v2388_v0  ;;  %v2415_v21 = vld [vmem:[%s3207_s3 + $0xb8] sm:$0xff]   ;;  %v2418_v23 = vld [vmem:[%s3207_s3 + $0xf0] sm:$0xff]   ;;  %2128 = vmatprep.subr.bf16.mxu0 %v2410_v18  ;;  %v2413_v33 = vld [vmem:[%s3207_s3 + $0x28] sm:$0xff]   ;;  %vm1807_vm9 = vcmask 687104   ;;  %s2500_s22 = smov [#allocation2]   ;;  %vm1855_vm10 = vcmask 74752  }
  0x6c   :  { %677 = vmatprep.mubr.bf16.mxu0 %v2392_v1  ;;  %2148 = vmatprep.subr.bf16.mxu1 %v2414_v20  ;;  %v2419_v28 = vld [vmem:[%s3207_s3 + $0xb0] sm:$0xff]   ;;  %v2416_v35 = vld [vmem:[%s3207_s3 + $0x60] sm:$0xff]   ;;  %v2423_v38 = vld [vmem:[%s3207_s3 + $0xa8] sm:$0xff]  }
  0x6d   :  { %2149 = vmatpush3.bf16.msra.mxu1 %v2415_v21  ;;  %v2426_v40 = vld [vmem:[%s3207_s3 + $0xe0] sm:$0xff]   ;;  %v2420_v45 = vld [vmem:[%s3207_s3 + $0x58] sm:$0xff]   ;;  %v2424_v55 = vld [vmem:[%s3207_s3 + $0x50] sm:$0xff]  }
  0x6e   :  { %806 = vmatmul.mubr.bf16.gmra.mxu1 %v2391_v2  ;;  %2150 = vmatprep.subr.bf16.mxu1 %v2418_v23  ;;  %v2417_v43 = vld [vmem:[%s3207_s3 + $0x20] sm:$0xff]   ;;  %v2430_v50 = vld [vmem:[%s3207_s3 + $0xd8] sm:$0xff]   ;;  %v2425_v62 = vld [vmem:[%s3207_s3 + $0x10] sm:$0xff]  }
  0x6f   :  { %1958 = vmatprep.mubr.msk.bf16.mxu1 %vm525_vm0, %v2395_v3  ;;  %2129 = vmatpush3.bf16.msra.mxu0 %v2411_v22  ;;  %v2427_v48 = vld [vmem:[%s3207_s3 + $0xa0] sm:$0xff]   ;;  %v2421_v53 = vld [vmem:[%s3207_s3 + $0x18] sm:$0xff]   ;;  %v2428_v0 = vld [vmem:[%s3207_s3 + $0x48] sm:$0xff]  }
  0x70   :  { %2130 = vmatprep.subr.bf16.mxu0 %v2412_v25  ;;  %v2431_v58 = vld [vmem:[%s3207_s3 + $0x98] sm:$0xff]   ;;  %v2432_v8 = vld [vmem:[%s3207_s3 + $0x40] sm:$0xff]  }
  0x71   :  { %2151 = vmatpush3.bf16.msra.mxu1 %v2419_v28 }
  0x72   :  { %2152 = vmatprep.subr.bf16.mxu1 %v2422_v30 }
  0x73   :  { %678 = vmatmul.mubr.bf16.gmra.mxu0 %v2394_v4 }
  0x74   :  { %685 = vmatprep.mubr.bf16.mxu0 %v2398_v5  ;;  %2131 = vmatpush3.bf16.msra.mxu0 %v2413_v33 }
  0x75   :  { %2132 = vmatprep.subr.bf16.mxu0 %v2416_v35  ;;  %2153 = vmatpush3.bf16.msra.mxu1 %v2423_v38 }
  0x76   :  { %814 = vmatmul.mubr.bf16.gmra.mxu1 %v2397_v6  ;;  %2154 = vmatprep.subr.bf16.mxu1 %v2426_v40  ;;  %v2429_v6 = vld [vmem:[%s3207_s3 + $0x8] sm:$0xff]  }
  0x77   :  { %1959 = vmatprep.mubr.msk.bf16.mxu1 %vm525_vm0, %v2401_v7 }
  0x78   :  { %2133 = vmatpush3.bf16.msra.mxu0 %v2417_v43 }
  0x79   :  { %2134 = vmatprep.subr.bf16.mxu0 %v2420_v45  ;;  %2155 = vmatpush3.bf16.msra.mxu1 %v2427_v48 }
  0x7a   :  { %2156 = vmatprep.subr.bf16.mxu1 %v2430_v50 }
  0x7b   :  { %686 = vmatmul.mubr.bf16.gmra.mxu0 %v2400_v9 }
  0x7c   :  { %693 = vmatprep.mubr.bf16.mxu0 %v1920_v10  ;;  %2135 = vmatpush3.bf16.msra.mxu0 %v2421_v53 }
  0x7d   :  { %2136 = vmatprep.subr.bf16.mxu0 %v2424_v55  ;;  %2157 = vmatpush3.bf16.msra.mxu1 %v2431_v58 }
  0x7e   :  { %822 = vmatmul.mubr.bf16.gmra.mxu1 %v2403_v12 }
  0x7f   :  { %1960 = vmatprep.mubr.msk.bf16.mxu1 %vm525_vm0, %v1922_v13 }
  0x80   :  { %2137 = vmatpush3.bf16.msra.mxu0 %v2425_v62 }
  0x81   :  { %2138 = vmatprep.subr.bf16.mxu0 %v2428_v0 }
  0x83   :  { %694 = vmatmul.mubr.bf16.gmra.mxu0 %v1919_v14  ;;  %v2433_v14 = vld [vmem:[%s3207_s3] sm:$0xff]  }
  0x84   :  { %2139 = vmatpush3.bf16.msra.mxu0 %v2429_v6 }
  0x85   :  { %2140 = vmatprep.subr.bf16.mxu0 %v2432_v8 }
  0x86   :  { %830 = vmatmul.mubr.bf16.gmra.mxu1 %v1921_v15 }
  0x88   :  { %2141 = vmatpush3.bf16.msra.mxu0 %v2433_v14 }
  0xe3   :  { %v2048_v19 = vpop.f32.mrf.mxu0 }
  0xe5   :  { %v2049_v24 = vpop.f32.mrf.mxu0 }
  0xe6   :  { %v2050_v26 = vadd.f32 %v2049_v24, %v2048_v19  ;;  %v735_v27 = vpop.f32.mrf.mxu1 }
  0xe7   :  { %v2051_v29 = vpop.f32.mrf.mxu0 }
  0xe8   :  { %v2819_v31 = vadd.f32 %v2050_v26, %v735_v27  ;;  %v737_v32 = vpop.f32.mrf.mxu1 }
  0xe9   :  { %v2052_v34 = vpop.f32.mrf.mxu0 }
  0xea   :  { %v2053_v36 = vadd.f32 %v2052_v34, %v2051_v29  ;;  %v738_v37 = vpop.f32.mrf.mxu1 }
  0xeb   :  { %v2054_v39 = vpop.f32.mrf.mxu0 }
  0xec   :  { %v2833_v41 = vadd.f32 %v2053_v36, %v738_v37  ;;  %v740_v42 = vpop.f32.mrf.mxu1 }
  0xed   :  { %v2055_v44 = vpop.f32.mrf.mxu0 }
  0xee   :  { %v2056_v46 = vadd.f32 %v2055_v44, %v2054_v39  ;;  %v743_v47 = vpop.f32.mrf.mxu1 }
  0xef   :  { %v2057_v49 = vpop.f32.mrf.mxu0 }
  0xf0   :  { %v2847_v51 = vadd.f32 %v2056_v46, %v743_v47  ;;  %v745_v52 = vpop.f32.mrf.mxu1 }
  0xf1   :  { %v2058_v54 = vpop.f32.mrf.mxu0 }
  0xf2   :  { %v2059_v56 = vadd.f32 %v2058_v54, %v2057_v49  ;;  %v746_v57 = vpop.f32.mrf.mxu1 }
  0xf3   :  { %v2060_v59 = vpop.f32.mrf.mxu0 }
  0xf4   :  { %v2858_v60 = vadd.f32 %v2059_v56, %v746_v57  ;;  %v748_v61 = vpop.f32.mrf.mxu1 }
  0xf5   :  { %v2061_v63 = vpop.f32.mrf.mxu0 }
  0xf6   :  { %v2062_v1 = vadd.f32 %v2061_v63, %v2060_v59  ;;  %v751_v2 = vpop.f32.mrf.mxu1 }
  0xf7   :  { %v2063_v3 = vpop.f32.mrf.mxu0 }
  0xf8   :  { %v2866_v4 = vadd.f32 %v2062_v1, %v751_v2  ;;  %v753_v5 = vpop.f32.mrf.mxu1 }
  0xf9   :  { %v2064_v7 = vpop.f32.mrf.mxu0 }
  0xfa   :  { %v2065_v9 = vadd.f32 %v2064_v7, %v2063_v3  ;;  %v754_v10 = vpop.f32.mrf.mxu1 }
  0xfb   :  { %v2066_v11 = vpop.f32.mrf.mxu0 }
  0xfc   :  { %v2874_v12 = vadd.f32 %v2065_v9, %v754_v10  ;;  %v756_v13 = vpop.f32.mrf.mxu1 }
  0xfd   :  { %v2067_v15 = vpop.f32.mrf.mxu0 }
  0xfe   :  { %v2068_v16 = vadd.f32 %v2067_v15, %v2066_v11  ;;  %v759_v17 = vpop.f32.mrf.mxu1 }
  0xff   :  { %v2069_v18 = vpop.f32.mrf.mxu0 }
 0x100   :  { %v760_v19 = vadd.f32 %v2068_v16, %v759_v17  ;;  %v761_v20 = vpop.f32.mrf.mxu1 }
 0x101   :  { %v2070_v21 = vpop.f32.mrf.mxu0 }
 0x102   :  { %v2071_v22 = vadd.f32 %v2070_v21, %v2069_v18  ;;  %v762_v23 = vpop.f32.mrf.mxu1  ;;  %v845_v28 = vrot.slane %v760_v19, 2 }
 0x103   :  { %v2072_v24 = vpop.f32.mrf.mxu0 }
 0x104   :  { %v2879_v25 = vadd.f32 %v2071_v22, %v762_v23  ;;  %v764_v26 = vpop.f32.mrf.mxu1 }
 0x105   :  { %v2073_v27 = vpop.f32.mrf.mxu0 }
 0x106   :  { %v846_v29 = vrot.slane %v2879_v25, 2  ;;  %v2882_v30 = vpop.f32.mrf.mxu1 }
 0x107   :  { %v2884_v32 = vpop.f32.mrf.mxu0 }
 0x108   :  { %v2889_v33 = vsel %vm844_vm1, %v845_v28, %v846_v29  ;;  %v769_v34 = vpop.f32.mrf.mxu1 }
 0x109   :  { %v865_v35 = vmax.f32 %v2819_v31, %v2889_v33  ;;  %v2893_v36 = vpop.f32.mrf.mxu0 }
 0x10a   :  { %v2895_v37 = vpop.f32.mrf.mxu1 }
 0x10b   :  { %v2897_v38 = vpop.f32.mrf.mxu0 }
 0x10c   :  { %v772_v39 = vpop.f32.mrf.mxu1 }
 0x10d   :  { %v2079_v40 = vpop.f32.mrf.mxu0  ;;  %v2074_v39 = vadd.f32 %v2073_v27, %v2072_v24 }
 0x10e   :  { %v2899_v42 = vpop.f32.mrf.mxu1  ;;  %v2080_v27 = vadd.f32 %v2079_v40, %v2897_v38 }
 0x10f   :  { %v2901_v43 = vpop.f32.mrf.mxu0 }
 0x110   :  { %v777_v44 = vpop.f32.mrf.mxu1  ;;  %v776_v40 = vadd.f32 %v2080_v27, %v2899_v42 }
 0x111   :  { %v2903_v45 = vpop.f32.mrf.mxu0 }
 0x112   :  { %v2905_v46 = vpop.f32.mrf.mxu1 }
 0x113   :  { %v2084_v47 = vpop.f32.mrf.mxu0 }
 0x114   :  { %v780_v48 = vpop.f32.mrf.mxu1 }
 0x115   :  { %v2085_v49 = vpop.f32.mrf.mxu0 }
 0x116   :  { %v2086_v50 = vadd.f32 %v2085_v49, %v2084_v47  ;;  %v783_v52 = vpop.f32.mrf.mxu1 }
 0x117   :  { %v2087_v53 = vpop.f32.mrf.mxu0 }
 0x118   :  { %v2907_v54 = vadd.f32 %v2086_v50, %v783_v52  ;;  %v785_v55 = vpop.f32.mrf.mxu1 }
 0x119   :  { %v2088_v56 = vpop.f32.mrf.mxu0 }
 0x11a   :  { %v856_v57 = vrot.slane %v2907_v54, 2  ;;  %v786_v58 = vpop.f32.mrf.mxu1 }
 0x11b   :  { %v2090_v59 = vpop.f32.mrf.mxu0 }
 0x11c   :  { %v2912_v61 = vmax.f32 %v760_v19, %v856_v57  ;;  %v788_v62 = vpop.f32.mrf.mxu1 }
 0x11d   :  { %v2091_v63 = vpop.f32.mrf.mxu0  ;;  %v2089_v62 = vadd.f32 %v2088_v56, %v2087_v53 }
 0x11e   :  { %v791_v0 = vpop.f32.mrf.mxu1 }
 0x11f   :  { %v2093_v1 = vpop.f32.mrf.mxu0 }
 0x120   :  { %v793_v2 = vpop.f32.mrf.mxu1 }
 0x121   :  { %v2094_v3 = vpop.f32.mrf.mxu0 }
 0x122   :  { %v2914_v5 = vpop.f32.mrf.mxu1 }
 0x123   :  { %v2916_v6 = vpop.f32.mrf.mxu0 }
 0x124   :  { %v796_v7 = vpop.f32.mrf.mxu1 }
 0x125   :  { %v2918_v8 = vpop.f32.mrf.mxu0  ;;  %v768_v7 = vadd.f32 %v2074_v39, %v2882_v30 }
 0x126   :  { %v2920_v9 = vpop.f32.mrf.mxu1 }
 0x127   :  { %v2922_v10 = vpop.f32.mrf.mxu0 }
 0x128   :  { %v801_v11 = vpop.f32.mrf.mxu1 }
 0x129   :  { %v2924_v13 = vpop.f32.mrf.mxu0 }
 0x12a   :  { %v2926_v14 = vpop.f32.mrf.mxu1 }
 0x12b   :  { %v2102_v15 = vpop.f32.mrf.mxu0 }
 0x12c   :  { %v804_v16 = vpop.f32.mrf.mxu1 }
 0x12d   :  { %v2103_v17 = vpop.f32.mrf.mxu0 }
 0x12e   :  { %v2104_v18 = vadd.f32 %v2103_v17, %v2102_v15  ;;  %v807_v19 = vpop.f32.mrf.mxu1  ;;  %v2077_v17 = vadd.f32 %v2893_v36, %v2884_v32  ;;  %v2083_v32 = vadd.f32 %v2903_v45, %v2901_v43 }
 0x12f   :  { %v2105_v20 = vpop.f32.mrf.mxu0 }
 0x130   :  { %v809_v21 = vpop.f32.mrf.mxu1  ;;  %v2928_v23 = vadd.f32 %v2104_v18, %v807_v19  ;;  %v771_v39 = vadd.f32 %v2077_v17, %v2895_v37  ;;  %v779_v42 = vadd.f32 %v2083_v32, %v2905_v46  ;;  %v2098_v46 = vadd.f32 %v2918_v8, %v2916_v6  ;;  %v2434_v6 = vld [vmem:[%s3207_s3 + $0xd0] sm:$0xff]  }
 0x131   :  { %v2106_v22 = vpop.f32.mrf.mxu0  ;;  %v787_v21 = vadd.f32 %v2089_v62, %v786_v58  ;;  %2158 = vmatprep.subr.bf16.mxu1 %v2434_v6 }
 0x132   :  { %v2107_v26 = vadd.f32 %v2106_v22, %v2105_v20  ;;  %v810_v28 = vpop.f32.mrf.mxu1  ;;  %v879_v49 = vrot.slane %v2928_v23, 2  ;;  %v2092_v22 = vadd.f32 %v2091_v63, %v2090_v59  ;;  %v854_v33 = vrot.slane %v779_v42, 2 }
 0x133   :  { %v2108_v34 = vpop.f32.mrf.mxu0 }
 0x134   :  { %v811_v44 = vadd.f32 %v2107_v26, %v810_v28  ;;  %v812_v47 = vpop.f32.mrf.mxu1  ;;  %v848_v26 = vrot.slane %v768_v7, 2 }
 0x135   :  { %v2109_v48 = vpop.f32.mrf.mxu0  ;;  %v2095_v47 = vadd.f32 %v2094_v3, %v2093_v1  ;;  %v852_v1 = vrot.slane %v776_v40, 2 }
 0x136   :  { %v880_v50 = vrot.slane %v811_v44, 2  ;;  %v2110_v52 = vadd.f32 %v2109_v48, %v2108_v34  ;;  %v815_v55 = vpop.f32.mrf.mxu1  ;;  %v792_v44 = vadd.f32 %v2092_v22, %v791_v0  ;;  %v849_v37 = vsel %vm844_vm1, %v846_v29, %v848_v26  ;;  %v2951_v0 = vld [vmem:[%s3206_s2] ss:$0 sm:$0xff] }
 0x137   :  { %v2111_v2 = vpop.f32.mrf.mxu0 }
 0x138   :  { %v881_v11 = vsel %vm844_vm1, %v879_v49, %v880_v50  ;;  %v816_v15 = vadd.f32 %v2110_v52, %v815_v55  ;;  %v817_v16 = vpop.f32.mrf.mxu1  ;;  %v850_v55 = vrot.slane %v771_v39, 2 }
 0x139   :  { %v2112_v24 = vpop.f32.mrf.mxu0  ;;  %v899_v53 = vmax.f32 %v2907_v54, %v881_v11 }
 0x13a   :  { %v882_v18 = vrot.slane %v816_v15, 2  ;;  %v2113_v19 = vadd.f32 %v2112_v24, %v2111_v2  ;;  %v818_v20 = vpop.f32.mrf.mxu1  ;;  %v795_v15 = vadd.f32 %v2095_v47, %v2914_v5  ;;  %v866_v24 = vmax.f32 %v2833_v41, %v849_v37  ;;  %v2435_v41 = vld [vmem:[%s3207_s3 + $0x90] sm:$0xff]  }
 0x13b   :  { %v2114_v56 = vpop.f32.mrf.mxu0  ;;  %v914_v48 = vrot.slane %v899_v53, 4  ;;  %v851_v31 = vsel %vm844_vm1, %v848_v26, %v850_v55  ;;  %v853_v8 = vsel %vm844_vm1, %v850_v55, %v852_v1  ;;  %v800_v26 = vadd.f32 %v2098_v46, %v2920_v9  ;;  %2159 = vmatpush3.bf16.msra.mxu1 %v2435_v41 }
 0x13c   :  { %v883_v30 = vsel %vm844_vm1, %v880_v50, %v882_v18  ;;  %v819_v28 = vadd.f32 %v2113_v19, %v818_v20  ;;  %v820_v34 = vpop.f32.mrf.mxu1  ;;  %v855_v9 = vsel %vm844_vm1, %v852_v1, %v854_v33  ;;  %v857_v47 = vsel %vm844_vm1, %v854_v33, %v856_v57 }
 0x13d   :  { %v900_v36 = vmax.f32 %v787_v21, %v883_v30  ;;  %v2115_v38 = vpop.f32.mrf.mxu0  ;;  %v869_v46 = vmax.f32 %v2866_v4, %v855_v9 }
 0x13e   :  { %v884_v58 = vrot.slane %v819_v28, 2  ;;  %v2116_v59 = vadd.f32 %v2115_v38, %v2114_v56  ;;  %v823_v63 = vpop.f32.mrf.mxu1  ;;  %v2101_v28 = vadd.f32 %v2924_v13, %v2922_v10 }
 0x13f   :  { %v915_v49 = vrot.slane %v900_v36, 4  ;;  %v2117_v50 = vpop.f32.mrf.mxu0  ;;  %v867_v36 = vmax.f32 %v2847_v51, %v851_v31 }
 0x140   :  { %v885_v52 = vsel %vm844_vm1, %v882_v18, %v884_v58  ;;  %v824_v43 = vadd.f32 %v2116_v59, %v823_v63  ;;  %v825_v45 = vpop.f32.mrf.mxu1  ;;  %v868_v63 = vmax.f32 %v2858_v60, %v853_v8  ;;  %v803_v37 = vadd.f32 %v2101_v28, %v2926_v14 }
 0x141   :  { %v916_v62 = vsel %vm913_vm2, %v914_v48, %v915_v49  ;;  %v901_v2 = vmax.f32 %v792_v44, %v885_v52  ;;  %v2118_v7 = vpop.f32.mrf.mxu0 }
 0x142   :  { %v934_v25 = vmax.f32 %v865_v35, %v916_v62  ;;  %v886_v29 = vrot.slane %v824_v43, 2  ;;  %v2119_v3 = vadd.f32 %v2118_v7, %v2117_v50  ;;  %v826_v11 = vpop.f32.mrf.mxu1 }
 0x143   :  { %v917_v16 = vrot.slane %v901_v2, 4  ;;  %v2120_v17 = vpop.f32.mrf.mxu0 }
 0x144   :  { %v887_v27 = vsel %vm844_vm1, %v884_v58, %v886_v29  ;;  %v827_v18 = vadd.f32 %v2119_v3, %v826_v11  ;;  %v828_v19 = vpop.f32.mrf.mxu1  ;;  %v948_v20 = vadd.f32 %v2951_v0, %v934_v25  ;;  %v2437_v11 = vld [vmem:[%s3207_s3 + $0x178] sm:$0xff]  }
 0x145   :  { %v918_v35 = vsel %vm913_vm2, %v915_v49, %v917_v16  ;;  %v902_v21 = vmax.f32 %v795_v15, %v887_v27  ;;  %v2121_v5 = vpop.f32.mrf.mxu0  ;;  %v2438_v15 = vld [vmem:[%s3207_s3 + $0x88] sm:$0xff]   ;;  %v870_v27 = vmax.f32 %v2874_v12, %v857_v47  ;;  %2170 = vmatprep.subr.bf16.mxu0 %v2437_v11 }
 0x146   :  { %v935_v22 = vmax.f32 %v866_v24, %v918_v35  ;;  %v888_v53 = vrot.slane %v827_v18, 2  ;;  %v2122_v56 = vadd.f32 %v2121_v5, %v2120_v17  ;;  %v831_v30 = vpop.f32.mrf.mxu1  ;;  %v2974_v39 = vmax.f32 %v948_v20, 0.0  ;;  %v2442_v5 = vld [vmem:[%s3207_s3 + $0x80] sm:$0xff]  }
 0x147   :  { %v919_v34 = vrot.slane %v902_v21, 4  ;;  %v2123_v32 = vpop.f32.mrf.mxu0  ;;  %v2440_v21 = vld [vmem:[%s3207_s3 + $0xc0] sm:$0xff]  }
 0x148   :  { %v889_v38 = vsel %vm844_vm1, %v886_v29, %v888_v53  ;;  %v832_v40 = vadd.f32 %v2122_v56, %v831_v30  ;;  %v949_v58 = vadd.f32 %v2951_v0, %v935_v22  ;;  %v833_v59 = vpop.f32.mrf.mxu1  ;;  %v971_v60 = vrot.slane %v2974_v39, 6 }
 0x149   :  { %v920_v10 = vsel %vm913_vm2, %v917_v16, %v919_v34  ;;  %v903_v13 = vmax.f32 %v800_v26, %v889_v38  ;;  %v2124_v44 = vpop.f32.mrf.mxu0  ;;  %v963_v43 = vrot.slane %v2974_v39, 2  ;;  %v967_v17 = vrot.slane %v2974_v39, 4 }
 0x14a   :  { %v936_v51 = vmax.f32 %v867_v36, %v920_v10  ;;  %v890_v48 = vrot.slane %v832_v40, 2  ;;  %v2985_v49 = vmax.f32 %v949_v58, 0.0  ;;  %v834_v50 = vpop.f32.mrf.mxu1  ;;  %v2498_v58 = vmov 0.0  }
 0x14b   :  { %v921_v52 = vrot.slane %v903_v13, 4 }
 0x14c   :  { %v891_v45 = vsel %vm844_vm1, %v888_v53, %v890_v48  ;;  %v905_v55 = vmax.f32 %v2928_v23, %v890_v48  ;;  %v984_v54 = vrot.slane %v2985_v49, 6  ;;  %v976_v57 = vrot.slane %v2985_v49, 2  ;;  %v835_v42 = vpop.f32.mrf.mxu1  ;;  %v2436_v23 = vld [vmem:[%s3207_s3 + $0xc8] sm:$0xff]  }
 0x14d   :  { %v922_v62 = vsel %vm913_vm2, %v919_v34, %v921_v52  ;;  %v904_v2 = vmax.f32 %v803_v37, %v891_v45  ;;  %v980_v7 = vrot.slane %v2985_v49, 4  ;;  %v950_v14 = vadd.f32 %v2951_v0, %v936_v51  ;;  %2160 = vmatprep.subr.bf16.mxu1 %v2436_v23 }
 0x14e   :  { %v937_v1 = vmax.f32 %v868_v63, %v922_v62  ;;  %v925_v25 = vrot.slane %v905_v55, 4  ;;  %v2272_v29 = vpack.i.bf16 %v971_v60, %v984_v54  ;;  %v2262_v3 = vpack.i.bf16 %v963_v43, %v976_v57  ;;  %2161 = vmatpush3.bf16.msra.mxu1 %v2438_v15 }
 0x14f   :  { %v923_v16 = vrot.slane %v904_v2, 4  ;;  %v3008_v24 = vmax.f32 %v950_v14, 0.0  ;;  %v2267_v31 = vpack.i.bf16 %v967_v17, %v980_v7  ;;  %2162 = vmatprep.subr.bf16.mxu1 %v2440_v21 }
 0x150   :  { %v940_v18 = vmax.f32 %v2912_v61, %v925_v25  ;;  %2273 = vrot.lane.b32.xlu1 %v2272_v29, %s2495_s23  ;;  %2263 = vrot.lane.b32.xlu0 %v2262_v3, %s2496_s24  ;;  %v951_v19 = vadd.f32 %v2951_v0, %v937_v1 }
 0x151   :  { %v924_v20 = vsel %vm913_vm2, %v921_v52, %v923_v16  ;;  %v926_v4 = vsel %vm913_vm2, %v923_v16, %v925_v25  ;;  %v989_v6 = vrot.slane %v3008_v24, 2  ;;  %v993_v22 = vrot.slane %v3008_v24, 4  ;;  %v2441_v16 = vld [vmem:[%s3207_s3 + $0x170] sm:$0xff]  }
 0x152   :  { %v938_v33 = vmax.f32 %v869_v46, %v924_v20  ;;  %v939_v35 = vmax.f32 %v870_v27, %v926_v4  ;;  %v3018_v12 = vadd.f32 %v2951_v0, %v940_v18  ;;  %v3020_v61 = vmax.f32 %v951_v19, 0.0  ;;  %2163 = vmatpush3.bf16.msra.mxu1 %v2442_v5 }
 0x153   :  { %v997_v36 = vrot.slane %v3008_v24, 6  ;;  %2211 = vmatprep.subr.bf16.mxu1 %v2498_v58 }
 0x154   :  { %v953_v41 = vadd.f32 %v2951_v0, %v939_v35  ;;  %2268 = vrot.lane.b32.xlu0 %v2267_v31, %s2497_s29  ;;  %v1002_v8 = vrot.slane %v3020_v61, 2  ;;  %v1006_v53 = vrot.slane %v3020_v61, 4  ;;  %v952_v56 = vadd.f32 %v2951_v0, %v938_v33 }
 0x155   :  { %v1010_v34 = vrot.slane %v3020_v61, 6 }
 0x156   :  { %v3034_v30 = vmax.f32 %v953_v41, 0.0  ;;  %v2277_v26 = vpack.i.bf16 %v989_v6, %v1002_v8  ;;  %v2282_v28 = vpack.i.bf16 %v993_v22, %v1006_v53  ;;  %v3037_v32 = vmax.f32 %v952_v56, 0.0  ;;  %v2446_v41 = vld [vmem:[%s3207_s3 + $0x188] sm:$0xff]  }
 0x157   :  { %v2287_v0 = vpack.i.bf16 %v997_v36, %v1010_v34  ;;  %v2447_v34 = vld [vmem:[%s3207_s3 + $0x160] sm:$0xff]  }
 0x158   :  { %2278 = vrot.lane.b32.xlu1 %v2277_v26, %s2496_s24  ;;  %2283 = vrot.lane.b32.xlu0 %v2282_v28, %s2497_s29  ;;  %v1043_v38 = vrot.slane %v3034_v30, 2  ;;  %v1030_v40 = vrot.slane %v3037_v32, 2  ;;  %v1034_v59 = vrot.slane %v3037_v32, 4  ;;  %v1047_v63 = vrot.slane %v3034_v30, 4  ;;  %v2445_v26 = vld [vmem:[%s3207_s3 + $0x128] sm:$0xff]  }
 0x159   :  { %v1038_v10 = vrot.slane %v3037_v32, 6  ;;  %v1051_v13 = vrot.slane %v3034_v30, 6 }
 0x15a   :  { %v2292_v9 = vpack.i.bf16 %v1030_v40, %v1043_v38  ;;  %v2297_v44 = vpack.i.bf16 %v1034_v59, %v1047_v63  ;;  %v961_v38 = vmax.f32 %v3018_v12, 0.0  ;;  %v2450_v59 = vld [vmem:[%s3207_s3 + $0x158] sm:$0xff]  }
 0x15b   :  { %v2302_v47 = vpack.i.bf16 %v1038_v10, %v1051_v13  ;;  %v2451_v12 = vld [vmem:[%s3207_s3 + $0x118] sm:$0xff]   ;;  %v2453_v10 = vld [vmem:[%s3207_s3 + $0x110] sm:$0xff]   ;;  %v2454_v13 = vld [vmem:[%s3207_s3 + $0x148] sm:$0xff]  }
 0x15c   :  { %2288 = vrot.lane.b32.xlu1 %v2287_v0, %s2495_s23  ;;  %2293 = vrot.lane.b32.xlu0 %v2292_v9, %s2496_s24  ;;  %v2448_v0 = vld [vmem:[%s3207_s3 + $0x120] sm:$0xff]   ;;  %v1067_v63 = vpack.c.bf16 %v961_v38, %v961_v38  ;;  %v2452_v9 = vld [vmem:[%s3207_s3 + $0x150] sm:$0xff]  }
 0x160   :  { %2298 = vrot.lane.b32.xlu1 %v2297_v44, %s2497_s29  ;;  %2303 = vrot.lane.b32.xlu0 %v2302_v47, %s2495_s23 }
 0x1c2   :  { %v2264_v51 = vpop.permute.xlu0 %2263  ;;  %v2274_v37 = vpop.permute.xlu1 %2273 }
 0x1c3   :  { %v2266_v48 = vunpack.i.h.bf16 %v2264_v51  ;;  %v2265_v50 = vunpack.i.l.bf16 %v2264_v51  ;;  %v2276_v45 = vunpack.i.h.bf16 %v2274_v37  ;;  %v2275_v55 = vunpack.i.l.bf16 %v2274_v37  ;;  %v2455_v51 = vld [vmem:[%s3207_s3 + $0x108] sm:$0xff]  }
 0x1c5   :  { %v1015_v54 = vsel %vm1014_vm3, %v2974_v39, %v2266_v48  ;;  %v1020_v57 = vsel %vm1014_vm3, %v2985_v49, %v2265_v50  ;;  %v2439_v39 = vld [vmem:[%s3207_s3 + $0x138] sm:$0xff]   ;;  %v2456_v48 = vld [vmem:[%s3207_s3 + $0x140] sm:$0xff]  }
 0x1c6   :  { %v2269_v52 = vpop.permute.xlu0 %2268 }
 0x1c7   :  { %v2271_v60 = vunpack.i.h.bf16 %v2269_v52  ;;  %v2270_v43 = vunpack.i.l.bf16 %v2269_v52 }
 0x1c9   :  { %v1017_v42 = vsel %vm1016_vm4, %v1015_v54, %v2271_v60  ;;  %v1021_v62 = vsel %vm1016_vm4, %v1020_v57, %v2270_v43  ;;  %v2457_v60 = vld [vmem:[%s3207_s3 + $0x100] sm:$0xff]   ;;  %v2459_v54 = vld [vmem:[%s3209_s5 + $0x30] sm:$0xff]   ;;  %v2460_v57 = vld [vmem:[%s3209_s5 + $0x28] sm:$0xff]  }
 0x1ca   :  { %v1019_v2 = vsel %vm1018_vm5, %v1017_v42, %v2276_v45  ;;  %v2279_v7 = vpop.permute.xlu1 %2278  ;;  %v2284_v14 = vpop.permute.xlu0 %2283  ;;  %v1022_v1 = vsel %vm1018_vm5, %v1021_v62, %v2275_v55  ;;  %v2461_v42 = vld [vmem:[%s3209_s5 + $0x20] sm:$0xff]   ;;  %v2462_v62 = vld [vmem:[%s3209_s5 + $0x18] sm:$0xff]  }
 0x1cb   :  { %v1061_v25 = vpack.c.bf16 %v1019_v2, %v1019_v2  ;;  %v2281_v29 = vunpack.i.h.bf16 %v2279_v7  ;;  %v2280_v3 = vunpack.i.l.bf16 %v2279_v7  ;;  %v2286_v23 = vunpack.i.h.bf16 %v2284_v14  ;;  %v2463_v2 = vld [vmem:[%s3209_s5 + $0x10] sm:$0xff]   ;;  %v2464_v7 = vld [vmem:[%s3209_s5 + $0x8] sm:$0xff]  }
 0x1cc   :  { %v2285_v11 = vunpack.i.l.bf16 %v2284_v14  ;;  %v1062_v15 = vpack.c.bf16 %v1022_v1, %v1022_v1  ;;  %v2465_v14 = vld [vmem:[%s3209_s5] sm:$0xff]   ;;  %v2466_v1 = vld [vmem:[%s3211_s7 + $0x28] ss:$0 sps:$4 sm:$0x33]  }
 0x1cd   :  { %v1023_v49 = vsel %vm1014_vm3, %v3008_v24, %v2281_v29  ;;  %v1026_v46 = vsel %vm1014_vm3, %v3020_v61, %v2280_v3  ;;  %v2443_v24 = vld [vmem:[%s3207_s3 + $0x130] sm:$0xff]   ;;  %v2444_v61 = vld [vmem:[%s3207_s3 + $0x168] sm:$0xff]   ;;  %v2467_v29 = vld [vmem:[%s3211_s7 + $0x20] sm:$0xff]  }
 0x1ce   :  { %1510 = vmatprep.mubr.bf16.mxu0 %v1062_v15  ;;  %v2289_v17 = vpop.permute.xlu1 %2288  ;;  %v2294_v19 = vpop.permute.xlu0 %2293  ;;  %v1024_v20 = vsel %vm1016_vm4, %v1023_v49, %v2286_v23  ;;  %v1027_v4 = vsel %vm1016_vm4, %v1026_v46, %v2285_v11  ;;  %v2468_v3 = vld [vmem:[%s3211_s7 + $0x18] sm:$0xff]   ;;  %v2469_v23 = vld [vmem:[%s3211_s7 + $0x10] sm:$0xff]  }
 0x1cf   :  { %v2291_v27 = vunpack.i.h.bf16 %v2289_v17  ;;  %v2290_v18 = vunpack.i.l.bf16 %v2289_v17  ;;  %1511 = vmatmul.mubr.bf16.vlgmr.msra.gmra.mxu0 %v1061_v25  ;;  %v2295_v31 = vunpack.i.l.bf16 %v2294_v19  ;;  %v2296_v44 = vunpack.i.h.bf16 %v2294_v19 }
 0x1d0   :  { %2171 = vmatpush3.bf16.msra.mxu0 %v2439_v39  ;;  %v1813_v25 = vsel %vm1811_vm7, %v2466_v1, 0 }
 0x1d1   :  { %v1025_v33 = vsel %vm1018_vm5, %v1024_v20, %v2291_v27  ;;  %2172 = vmatprep.subr.bf16.mxu0 %v2441_v16  ;;  %v1028_v35 = vsel %vm1018_vm5, %v1027_v4, %v2290_v18  ;;  %v1058_v53 = vsel %vm1014_vm3, %v3034_v30, %v2295_v31  ;;  %v2449_v30 = vld [vmem:[%s3207_s3 + $0x180] sm:$0xff]   ;;  %v1055_v50 = vsel %vm1014_vm3, %v3037_v32, %v2296_v44  ;;  %v2458_v32 = vld [vmem:[%s3209_s5 + $0x38] ss:$0 sps:$4 sm:$0xff]  }
 0x1d2   :  { %v1063_v21 = vpack.c.bf16 %v1025_v33, %v1025_v33  ;;  %v2299_v5 = vpop.permute.xlu1 %2298  ;;  %v1064_v6 = vpack.c.bf16 %v1028_v35, %v1028_v35  ;;  %v2304_v22 = vpop.permute.xlu0 %2303  ;;  %v1712_v55 = vsel %vm913_vm2, %v2458_v32, 0 }
 0x1d3   :  { %v2300_v8 = vunpack.i.l.bf16 %v2299_v5  ;;  %v2305_v56 = vunpack.i.l.bf16 %v2304_v22  ;;  %v2301_v47 = vunpack.i.h.bf16 %v2299_v5  ;;  %v2306_v37 = vunpack.i.h.bf16 %v2304_v22 }
 0x1d4   :  { %2173 = vmatpush3.bf16.msra.mxu0 %v2443_v24  ;;  %1550 = vmatprep.mubr.bf16.mxu1 %v1064_v6  ;;  %v1962_v24 = vld [vmem:[%s3208_s4] ss:$0 sm:$0xff] }
 0x1d5   :  { %v1059_v28 = vsel %vm1016_vm4, %v1058_v53, %v2300_v8  ;;  %1551 = vmatmul.mubr.bf16.vlgmr.msra.gmra.mxu1 %v1063_v21  ;;  %2174 = vmatprep.subr.bf16.mxu0 %v2444_v61  ;;  %v1056_v52 = vsel %vm1016_vm4, %v1055_v50, %v2301_v47 }
 0x1d6   :  { %2212 = vmatpush3.bf16.msra.mxu1 %v2446_v41  ;;  %v1060_v36 = vsel %vm1018_vm5, %v1059_v28, %v2305_v56  ;;  %2215 = vmatprep.mubr.msk.bf16.mxu1 %vm2499_vm6, %v2498_v58  ;;  %v1057_v43 = vsel %vm1018_vm5, %v1056_v52, %v2306_v37  ;;  %v2470_v28 = vld [vmem:[%s3211_s7 + $0x8] sm:$0xff]  }
 0x1d7   :  { %v1066_v40 = vpack.c.bf16 %v1060_v36, %v1060_v36  ;;  %2213 = vmatprep.subr.bf16.mxu1 %v2498_v58  ;;  %v1065_v45 = vpack.c.bf16 %v1057_v43, %v1057_v43  ;;  %v2014_v36 = vld [vmem:[%s3210_s6] ss:$0 sm:$0xff] }
 0x1d8   :  { %2175 = vmatpush3.bf16.msra.mxu0 %v2445_v26 }
 0x1d9   :  { %2176 = vmatprep.subr.bf16.mxu0 %v2447_v34  ;;  %1590 = vmatprep.mubr.bf16.mxu0 %v1066_v40  ;;  %v2471_v34 = vld [vmem:[%s3211_s7] sm:$0xff]   ;;  %s1863_s7 = sshll.u32 %s2500_s22, 4  ;;  %s1864_s7 = int_to_ptr.vmem [resolvable:$true] %s1863_s7 }
 0x1da   :  { %2214 = vmatpush3.bf16.msra.mxu1 %v2449_v30  ;;  %s2472_s6 = scalar_lea.vmem %s1864_s7, 32  ;;  %p2477_p1 = scmp.lt.s32.totalorder %s1864_s7, %s1864_s7 }
 0x1db   :  { %2219 = vmatprep.subr.bf16.mxu1 %v2498_v58  ;;  %p2473_p0 = scmp.ne.s32.totalorder %s1864_s7, %s2472_s6  ;;  %p2478_p2 = scmp.lt.s32.totalorder %s2472_s6, %s2472_s6 }
 0x1dc   :  { %2177 = vmatpush3.bf16.msra.mxu0 %v2448_v0 }
 0x1dd   :  { %2178 = vmatprep.subr.bf16.mxu0 %v2450_v59  ;;  %2216 = vmatmul.mubr.msk.bf16.vlgmr.msra.gmra.mxu1 %vm1014_vm3, %v1067_v63  ;;  %p2479_p3 = por %p2478_p2, %p2477_p1 }
 0x1de   :  { %2235 = vmatprep.mubr.msk.bf16.mxu1 %vm2499_vm6, %v2498_v58  ;;  %2220 = vmatpush3.bf16.msra.mxu1 %v1712_v55 }
 0x1df   :  { %2221 = vmatprep.subr.bf16.mxu1 %v2498_v58  ;;  %p2480_p4 = pnand %p2479_p3, %p2473_p0 }
 0x1e0   :  { %2179 = vmatpush3.bf16.msra.mxu0 %v2451_v12 }
 0x1e1   :  { %2180 = vmatprep.subr.bf16.mxu0 %v2452_v9 }
 0x1e2   :  { %2222 = vmatpush3.bf16.msra.mxu1 %v2459_v54 }
 0x1e3   :  { %2223 = vmatprep.subr.bf16.mxu1 %v2498_v58 }
 0x1e4   :  { %2181 = vmatpush3.bf16.msra.mxu0 %v2453_v10 }
 0x1e5   :  { %2182 = vmatprep.subr.bf16.mxu0 %v2454_v13 }
 0x1e6   :  { %2224 = vmatpush3.bf16.msra.mxu1 %v2460_v57 }
 0x1e7   :  { %2225 = vmatprep.subr.bf16.mxu1 %v2498_v58 }
 0x1e8   :  { %2183 = vmatpush3.bf16.msra.mxu0 %v2455_v51 }
 0x1e9   :  { %2184 = vmatprep.subr.bf16.mxu0 %v2456_v48 }
 0x1ea   :  { %2226 = vmatpush3.bf16.msra.mxu1 %v2461_v42 }
 0x1eb   :  { %2227 = vmatprep.subr.bf16.mxu1 %v2498_v58 }
 0x1ec   :  { %2185 = vmatpush3.bf16.msra.mxu0 %v2457_v60 }
 0x1ed   :  { %2239 = vmatprep.subr.bf16.mxu0 %v2498_v58 }
 0x1ee   :  { %2228 = vmatpush3.bf16.msra.mxu1 %v2462_v62 }
 0x1ef   :  { %1591 = vmatmul.mubr.bf16.vlgmr.msra.gmra.mxu0 %v1065_v45  ;;  %2229 = vmatprep.subr.bf16.mxu1 %v2498_v58 }
 0x1f0   :  { %2251 = vmatprep.mubr.msk.bf16.mxu0 %vm2499_vm6, %v2498_v58  ;;  %2240 = vmatpush3.bf16.msra.mxu0 %v1813_v25 }
 0x1f1   :  { %2241 = vmatprep.subr.bf16.mxu0 %v2498_v58 }
 0x1f2   :  { %2230 = vmatpush3.bf16.msra.mxu1 %v2463_v2 }
 0x1f3   :  { %2231 = vmatprep.subr.bf16.mxu1 %v2498_v58 }
 0x1f4   :  { %2242 = vmatpush3.bf16.msra.mxu0 %v2467_v29 }
 0x1f5   :  { %2243 = vmatprep.subr.bf16.mxu0 %v2498_v58 }
 0x1f6   :  { %2232 = vmatpush3.bf16.msra.mxu1 %v2464_v7 }
 0x1f7   :  { %2233 = vmatprep.subr.bf16.mxu1 %v2498_v58 }
 0x1f8   :  { %2244 = vmatpush3.bf16.msra.mxu0 %v2468_v3 }
 0x1f9   :  { %2245 = vmatprep.subr.bf16.mxu0 %v2498_v58 }
 0x1fa   :  { %2234 = vmatpush3.bf16.msra.mxu1 %v2465_v14 }
 0x1fc   :  { %2246 = vmatpush3.bf16.msra.mxu0 %v2469_v23 }
 0x1fd   :  { %2247 = vmatprep.subr.bf16.mxu0 %v2498_v58 }
 0x200   :  { %2248 = vmatpush3.bf16.msra.mxu0 %v2470_v28 }
 0x201   :  { %2249 = vmatprep.subr.bf16.mxu0 %v2498_v58  ;;  %v2024_v58 = vld [vmem:[%s3212_s8] ss:$0 sm:$0xff] }
 0x204   :  { %2250 = vmatpush3.bf16.msra.mxu0 %v2471_v34 }
 0x28f   :  { %v2142_v11 = vpop.f32.mrf.mxu0 }
 0x291   :  { %v2143_v15 = vpop.f32.mrf.mxu0 }
 0x292   :  { %v2144_v31 = vadd.f32 %v2143_v15, %v2142_v11 }
 0x293   :  { %v2145_v39 = vpop.f32.mrf.mxu0 }
 0x294   :  { %v1513_v61 = vadd.f32 %v2144_v31, %v1962_v24 }
 0x295   :  { %v2146_v49 = vpop.f32.mrf.mxu0  ;;  %v2164_v46 = vpop.f32.mrf.mxu1 }
 0x297   :  { %v2165_v16 = vpop.f32.mrf.mxu1 }
 0x298   :  { %v2166_v33 = vadd.f32 %v2165_v16, %v2164_v46 }
 0x299   :  { %v2167_v17 = vpop.f32.mrf.mxu1 }
 0x29a   :  { %v1553_v5 = vadd.f32 %v2166_v33, %v1513_v61 }
 0x29b   :  { %v2168_v27 = vpop.f32.mrf.mxu1 }
 0x29d   :  { %v1632_v18 = vpop.f32.mrf.mxu1 }
 0x29f   :  { %v2217_v19 = vpop.f32.mrf.mxu1 }
 0x2a1   :  { %v1635_v20 = vpop.f32.mrf.mxu1 }
 0x2a3   :  { %v2218_v4 = vpop.f32.mrf.mxu1 }
 0x2af   :  { %v2186_v35 = vpop.f32.mrf.mxu0 }
 0x2b1   :  { %v2187_v21 = vpop.f32.mrf.mxu0 }
 0x2b2   :  { %v2188_v6 = vadd.f32 %v2187_v21, %v2186_v35 }
 0x2b3   :  { %v2189_v41 = vpop.f32.mrf.mxu0 }
 0x2b4   :  { %v1593_v8 = vadd.f32 %v2188_v6, %v1553_v5 }
 0x2b5   :  { %v2190_v22 = vpop.f32.mrf.mxu0 }
 0x2b6   :  { %v1633_v53 = vadd.f32 %v1632_v18, %v1593_v8 }
 0x2b8   :  { %v1638_v56 = vmax.f32 %v1633_v53, 0.0 }
 0x2ba   :  { %v1639_v26 = vpack.c.bf16 %v1638_v56, %v1638_v56 }
 0x2bc   :  { %2236 = vmatmul.mubr.msk.bf16.vlgmr.msra.gmra.mxu1 %vm1707_vm8, %v1639_v26 }
 0x37c   :  { %v1748_v30 = vpop.f32.mrf.mxu1 }
 0x37d   :  { %v1749_v38 = vadd.f32 %v2014_v36, %v1748_v30 }
 0x37e   :  { %v2237_v40 = vpop.f32.mrf.mxu1 }
 0x37f   :  { %v1754_v0 = vmax.f32 %v1749_v38, 0.0 }
 0x380   :  { %v1751_v59 = vpop.f32.mrf.mxu1 }
 0x381   :  { %v1755_v63 = vpack.c.bf16 %v1754_v0, %v1754_v0 }
 0x382   :  { %v2238_v12 = vpop.f32.mrf.mxu1 }
 0x383   :  { %2252 = vmatmul.mubr.msk.bf16.vlgmr.msra.gmra.mxu0 %vm1807_vm9, %v1755_v63 }
 0x443   :  { %v1849_v9 = vpop.f32.mrf.mxu0 }
 0x444   :  { %v1850_v10 = vadd.f32 %v2024_v58, %v1849_v9 }
 0x445   :  { %v2253_v13 = vpop.f32.mrf.mxu0 }
 0x446   :  { %1856 = vst.msk [vmem:[#allocation2] sm:$0x3] %vm1855_vm10, %v1850_v10 }
 0x447   :  { %v1852_v44 = vpop.f32.mrf.mxu0 }
 0x448   :  { %2483 = shalt.err (!%p2480_p4)
}
 0x449   :  { %1866 = dma.vmem_to_hbm [thread:$0]  %s1864_s7, 32, %s3213_s9, [#allocation3]   ;;  %v2254_v47 = vpop.f32.mrf.mxu0 }
 0x44a   :  { %2492 = dma.done.wait [#allocation3], 32  }
 0x44b   :  { %2493 = vsyncadd [#allocation3], 4294967264 }
 0x44c   :  { %1870 = vsyncpa [#allocation3], 1 }

</bundles_post_ra>
